<compile_context>
chip_gen: v5e
topology: v5e:2x2
jax: 0.10.0
libtpu: 0.0.40
codegen_flags: <defaults>
</compile_context>

<pallas_src>
import jax
import jax.numpy as jnp
from jax import lax
from jax.experimental import pallas as pl
from jax.experimental.pallas import tpu as pltpu

LANE = 128


def _round_up(x, m=LANE):
    return (x + m - 1) // m * m


# -----------------------------------------------------------------------------
# Pallas kernel: whole bottleneck block for a (B_tile, H, W, Cp) batch block.
#   conv1 (1x1)                      -> one matmul over channels
#   conv2 (3x3, pad=1, stride=1)     -> one im2col matmul (9*Pp contraction)
#   conv3 (1x1)                      -> one matmul over channels
#   BatchNorm scale is folded into the weights; bias + ReLU + residual fused.
# -----------------------------------------------------------------------------
def _bottleneck_kernel(x_ref, w1_ref, b1_ref, w2_ref, b2_ref, w3_ref, b3_ref,
                       o_ref, pad_ref):
    B, H, W, Cp = x_ref.shape
    Pp = w1_ref.shape[1]

    x2d = x_ref[...].reshape(B * H * W, Cp).astype(jnp.float32)

    # ---- conv1 (1x1, BN scale folded into w1) + bias + ReLU ----
    y1 = jnp.dot(x2d, w1_ref[...], preferred_element_type=jnp.float32)
    y1 = jnp.maximum(y1 + b1_ref[...], 0.0)                  # (B*HW, Pp)

    # ---- conv2 (3x3, pad=1) as a single im2col matmul + bias + ReLU ----
    # Zero only the 1-pixel halo of the padded scratch; the interior is fully
    # rewritten below.  Re-zeroed every grid step so it remains correct when
    # the batch axis is sharded across TensorCores ("parallel").
    zrow = jnp.zeros((B, 1, W + 2, Pp), jnp.float32)
    zcol = jnp.zeros((B, H, 1, Pp), jnp.float32)
    pad_ref[:, 0:1, :, :] = zrow
    pad_ref[:, H + 1:H + 2, :, :] = zrow
    pad_ref[:, 1:H + 1, 0:1, :] = zcol
    pad_ref[:, 1:H + 1, W + 1:W + 2, :] = zcol
    pad_ref[:, 1:H + 1, 1:W + 1, :] = y1.reshape(B, H, W, Pp)

    taps = [pad_ref[:, dy:dy + H, dx:dx + W, :].reshape(B * H * W, Pp)
            for dy in range(3) for dx in range(3)]
    patch = jnp.concatenate(taps, axis=1)                    # (B*HW, 9*Pp)
    y2 = jnp.dot(patch, w2_ref[...], preferred_element_type=jnp.float32)
    y2 = jnp.maximum(y2 + b2_ref[...], 0.0)                  # (B*HW, Pp)

    # ---- conv3 (1x1, BN scale folded) + bias, residual add, final ReLU ----
    y3 = jnp.dot(y2, w3_ref[...], preferred_element_type=jnp.float32)
    out = jnp.maximum(y3 + b3_ref[...] + x2d, 0.0)
    o_ref[...] = out.reshape(B, H, W, Cp).astype(o_ref.dtype)


# -----------------------------------------------------------------------------
# Wrapper: NHWC fused bottleneck forward.
# -----------------------------------------------------------------------------
def bottleneck_forward_nhwc(x, kparams, *, block_batch=None):
    """x: (N, H, W, Cin) float32.  stride=1, downsample=None (Cin == planes*4).
    kparams come from prepare_kernel_params (BN folded, channels lane-padded)."""
    w1, b1, w2, b2, w3, b3 = kparams
    N, H, W, cin = x.shape
    Cp, Pp = w1.shape                       # lane-padded channel dims
    assert w3.shape == (Pp, Cp)

    # Lane-pad the channel dim (no-op for real ResNet widths, which are already
    # multiples of 128).  Padded weight rows/cols are zero, so extra lanes
    # contribute nothing and stay zero through the residual path.
    if Cp != cin:
        x = jnp.pad(x, ((0, 0), (0, 0), (0, 0), (0, Cp - cin)))

    # Batch elements per grid step: largest divisor of N within a modest
    # per-block VMEM budget (input block <= 2 MiB, <= 8 images).
    if block_batch is None:
        block_batch = 1
        for cand in range(1, N + 1):
            if N % cand == 0 and cand <= 8 and cand * H * W * Cp * 4 <= (2 << 20):
                block_batch = cand
    assert N % block_batch == 0
    grid = (N // block_batch,)

    full = lambda a: pl.BlockSpec(a.shape, lambda n: (0,) * a.ndim)
    io_spec = pl.BlockSpec((block_batch, H, W, Cp), lambda n: (n, 0, 0, 0))

    flops = 2 * N * H * W * (Cp * Pp + 9 * Pp * Pp + Pp * Cp)
    weight_bytes = 4 * sum(int(a.size) for a in (w1, b1, w2, b2, w3, b3))
    bytes_accessed = 8 * N * H * W * Cp + weight_bytes

    out = pl.pallas_call(
        _bottleneck_kernel,
        out_shape=jax.ShapeDtypeStruct((N, H, W, Cp), x.dtype),
        grid=grid,
        in_specs=[io_spec,
                  full(w1), full(b1),
                  full(w2), full(b2),
                  full(w3), full(b3)],
        out_specs=io_spec,
        scratch_shapes=[
            pltpu.VMEM((block_batch, H + 2, W + 2, Pp), jnp.float32)],
        compiler_params=pltpu.CompilerParams(
            dimension_semantics=("parallel",),          # batch blocks independent
            vmem_limit_bytes=48 * 1024 * 1024),
        cost_estimate=pl.CostEstimate(
            flops=flops, transcendentals=0, bytes_accessed=bytes_accessed),
    )(x, w1, b1, w2, b2, w3, b3)

    if Cp != cin:
        out = out[..., :cin]
    return out


# -----------------------------------------------------------------------------
# Parameter construction (PyTorch-style) + BN folding / lane padding for kernel.
# -----------------------------------------------------------------------------
def make_torch_params(key, inplanes, planes):
    """PyTorch-layout Bottleneck params (conv OIHW weights + raw BN stats)."""
    expansion = 4
    outplanes = planes * expansion
    assert inplanes == outplanes, \
        "stride=1 / downsample=None requires Cin == planes*4"
    ks = jax.random.split(key, 6)

    w1_t = 0.1 * jax.random.normal(ks[0], (planes, inplanes, 1, 1), jnp.float32)
    w2_t = 0.1 * jax.random.normal(ks[1], (planes, planes, 3, 3), jnp.float32)
    w3_t = 0.1 * jax.random.normal(ks[2], (outplanes, planes, 1, 1), jnp.float32)

    def bn(k, c):
        kg, kb, km, kv = jax.random.split(k, 4)
        gamma = jax.random.uniform(kg, (c,), jnp.float32, 0.5, 1.5)
        beta = 0.1 * jax.random.normal(kb, (c,), jnp.float32)
        mean = 0.1 * jax.random.normal(km, (c,), jnp.float32)
        var = jax.random.uniform(kv, (c,), jnp.float32, 0.5, 1.5)
        return (gamma, beta, mean, var)

    bn1 = bn(ks[3], planes)
    bn2 = bn(ks[4], planes)
    bn3 = bn(ks[5], outplanes)
    return (w1_t, bn1, w2_t, bn2, w3_t, bn3)


def prepare_kernel_params(w1_t, bn1, w2_t, bn2, w3_t, bn3, eps=1e-5):
    """Fold eval-mode BN scale into the conv weights, convert to matmul form,
    and zero-pad channel dims to lane (128) multiples."""
    def fold(raw):
        g, b, m, v = raw
        s = g / jnp.sqrt(v + eps)
        return s, b - m * s

    s1, b1 = fold(bn1)
    s2, b2 = fold(bn2)
    s3, b3 = fold(bn3)

    planes, cin = w1_t.shape[0], w1_t.shape[1]
    cout = w3_t.shape[0]
    Pp, Cinp, Coutp = _round_up(planes), _round_up(cin), _round_up(cout)

    # Fold BN scale per output channel into the conv weights.
    w1 = (w1_t[:, :, 0, 0] * s1[:, None]).T                          # (Cin, P)
    w2 = jnp.transpose(w2_t * s2[:, None, None, None], (2, 3, 1, 0))  # (3,3,P,P)
    w3 = (w3_t[:, :, 0, 0] * s3[:, None]).T                          # (P, Cout)

    # Lane-pad (zeros) -> padded rows/cols contribute nothing.
    w1 = jnp.pad(w1, ((0, Cinp - cin), (0, Pp - planes)))            # (Cinp, Pp)
    w2 = jnp.pad(w2, ((0, 0), (0, 0),
                      (0, Pp - planes), (0, Pp - planes)))
    w2 = w2.reshape(9 * Pp, Pp)                                      # im2col form
    w3 = jnp.pad(w3, ((0, Pp - planes), (0, Coutp - cout)))          # (Pp, Coutp)

    b1 = jnp.pad(b1, (0, Pp - planes))[None, :]
    b2 = jnp.pad(b2, (0, Pp - planes))[None, :]
    b3 = jnp.pad(b3, (0, Coutp - cout))[None, :]
    return (w1, b1, w2, b2, w3, b3)


# -----------------------------------------------------------------------------
# Pure-JAX NCHW reference matching PyTorch eval-mode Bottleneck semantics.
# -----------------------------------------------------------------------------
def reference_forward(x, torch_params, eps=1e-5):
    w1, bn1, w2, bn2, w3, bn3 = torch_params

    def conv(x, w, pad):
        return lax.conv_general_dilated(
            x, w, window_strides=(1, 1), padding=pad,
            dimension_numbers=("NCHW", "OIHW", "NCHW"))

    def bn_eval(x, raw):
        g, b, m, v = raw
        g, b, m, v = (t[None, :, None, None] for t in (g, b, m, v))
        return (x - m) / jnp.sqrt(v + eps) * g + b

    out = jax.nn.relu(bn_eval(conv(x, w1, [(0, 0), (0, 0)]), bn1))
    out = jax.nn.relu(bn_eval(conv(out, w2, [(1, 1), (1, 1)]), bn2))
    out = bn_eval(conv(out, w3, [(0, 0), (0, 0)]), bn3)
    return jax.nn.relu(out + x)


if __name__ == "__main__":
    key = jax.random.PRNGKey(0)
    k_x, k_p = jax.random.split(key)

    inplanes, planes = 16, 4          # expansion=4 -> outplanes == inplanes
    N, H, W = 2, 8, 8
    x_nchw = jax.random.normal(k_x, (N, inplanes, H, W), jnp.float32)

    torch_params = make_torch_params(k_p, inplanes, planes)
    kernel_params = prepare_kernel_params(*torch_params)

    # One-time layout change at the network boundary (the kernel itself is NHWC).
    x_nhwc = jnp.transpose(x_nchw, (0, 2, 3, 1))
    out_nhwc = jax.block_until_ready(bottleneck_forward_nhwc(x_nhwc, kernel_params))
    out = jnp.transpose(out_nhwc, (0, 3, 1, 2))

    ref = reference_forward(x_nchw, torch_params)
    assert out.shape == ref.shape == (N, inplanes, H, W)
    max_err = float(jnp.max(jnp.abs(out - ref)))
    assert jnp.allclose(out, ref, rtol=2e-4, atol=2e-4), max_err

    print("KERNEL_OK")
</pallas_src>

<mosaic_0001>
module attributes {stable_mosaic.version = 11 : i64} {
  func.func @_bottleneck_kernel(%arg0: i32, %arg1: memref<2x8x8x128xf32, #tpu.memory_space<vmem>>, %arg2: memref<128x128xf32, #tpu.memory_space<vmem>>, %arg3: memref<1x128xf32, #tpu.memory_space<vmem>>, %arg4: memref<1152x128xf32, #tpu.memory_space<vmem>>, %arg5: memref<1x128xf32, #tpu.memory_space<vmem>>, %arg6: memref<128x128xf32, #tpu.memory_space<vmem>>, %arg7: memref<1x128xf32, #tpu.memory_space<vmem>>, %arg8: memref<2x8x8x128xf32, #tpu.memory_space<vmem>>, %arg9: memref<2x10x10x128xf32, #tpu.memory_space<vmem>>) attributes {dimension_semantics = [#tpu.dimension_semantics<parallel>], iteration_bounds = array<i64: 1>, scalar_prefetch = 0 : i64, scratch_operands = 1 : i64, tpu.core_type = #tpu.core_type<tc>, window_params = [{transform_indices = @transform_0, window_bounds = array<i64: 2, 8, 8, 128>}, {pipeline_mode = #tpu.pipeline_mode<synchronous>, transform_indices = @transform_1, window_bounds = array<i64: 128, 128>}, {pipeline_mode = #tpu.pipeline_mode<synchronous>, transform_indices = @transform_2, window_bounds = array<i64: 1, 128>}, {pipeline_mode = #tpu.pipeline_mode<synchronous>, transform_indices = @transform_3, window_bounds = array<i64: 1152, 128>}, {pipeline_mode = #tpu.pipeline_mode<synchronous>, transform_indices = @transform_4, window_bounds = array<i64: 1, 128>}, {pipeline_mode = #tpu.pipeline_mode<synchronous>, transform_indices = @transform_5, window_bounds = array<i64: 128, 128>}, {pipeline_mode = #tpu.pipeline_mode<synchronous>, transform_indices = @transform_6, window_bounds = array<i64: 1, 128>}, {transform_indices = @transform_7, window_bounds = array<i64: 2, 8, 8, 128>}]} {
    %c0 = arith.constant 0 : index
    %c0_0 = arith.constant 0 : index
    %c0_1 = arith.constant 0 : index
    %c0_2 = arith.constant 0 : index
    %0 = vector.load %arg1[%c0, %c0_0, %c0_1, %c0_2] : memref<2x8x8x128xf32, #tpu.memory_space<vmem>>, vector<2x8x8x128xf32>
    %1 = vector.shape_cast %0 : vector<2x8x8x128xf32> to vector<128x128xf32>
    %c0_3 = arith.constant 0 : index
    %c0_4 = arith.constant 0 : index
    %2 = vector.load %arg2[%c0_3, %c0_4] : memref<128x128xf32, #tpu.memory_space<vmem>>, vector<128x128xf32>
    %cst = arith.constant dense<0.000000e+00> : vector<128x128xf32>
    %3 = tpu.matmul %1, %2, %cst {dimension_numbers = #tpu.dot_dimension_numbers<[1], [0], [0], [1], [0, 0, 1, 1], [], []>} : vector<128x128xf32>, vector<128x128xf32>, vector<128x128xf32> -> vector<128x128xf32>
    %c0_5 = arith.constant 0 : index
    %c0_6 = arith.constant 0 : index
    %4 = vector.load %arg3[%c0_5, %c0_6] : memref<1x128xf32, #tpu.memory_space<vmem>>, vector<1x128xf32>
    %5 = vector.broadcast %4 : vector<1x128xf32> to vector<128x128xf32>
    %6 = arith.addf %3, %5 : vector<128x128xf32>
    %cst_7 = arith.constant 0.000000e+00 : f32
    %7 = vector.broadcast %cst_7 : f32 to vector<128x128xf32>
    %8 = arith.maximumf %6, %7 : vector<128x128xf32>
    %cst_8 = arith.constant 0.000000e+00 : f32
    %9 = vector.broadcast %cst_8 : f32 to vector<2x1x10x128xf32>
    %cst_9 = arith.constant 0.000000e+00 : f32
    %10 = vector.broadcast %cst_9 : f32 to vector<2x8x1x128xf32>
    %c0_10 = arith.constant 0 : index
    %c0_11 = arith.constant 0 : index
    %c0_12 = arith.constant 0 : index
    %c0_13 = arith.constant 0 : index
    %11 = vector.load %arg9[%c0_10, %c0_11, %c0_12, %c0_13] : memref<2x10x10x128xf32, #tpu.memory_space<vmem>>, vector<2x1x10x128xf32>
    tpu.vector_store %arg9[%c0_10, %c0_11, %c0_12, %c0_13], %9 {strides = array<i32>} : memref<2x10x10x128xf32, #tpu.memory_space<vmem>>, vector<2x1x10x128xf32>,
    %c0_14 = arith.constant 0 : index
    %c9 = arith.constant 9 : index
    %c0_15 = arith.constant 0 : index
    %c0_16 = arith.constant 0 : index
    %12 = vector.load %arg9[%c0_14, %c9, %c0_15, %c0_16] : memref<2x10x10x128xf32, #tpu.memory_space<vmem>>, vector<2x1x10x128xf32>
    tpu.vector_store %arg9[%c0_14, %c9, %c0_15, %c0_16], %9 {strides = array<i32>} : memref<2x10x10x128xf32, #tpu.memory_space<vmem>>, vector<2x1x10x128xf32>,
    %c0_17 = arith.constant 0 : index
    %c1 = arith.constant 1 : index
    %c0_18 = arith.constant 0 : index
    %c0_19 = arith.constant 0 : index
    %13 = vector.load %arg9[%c0_17, %c1, %c0_18, %c0_19] : memref<2x10x10x128xf32, #tpu.memory_space<vmem>>, vector<2x8x1x128xf32>
    tpu.vector_store %arg9[%c0_17, %c1, %c0_18, %c0_19], %10 {strides = array<i32>} : memref<2x10x10x128xf32, #tpu.memory_space<vmem>>, vector<2x8x1x128xf32>,
    %c0_20 = arith.constant 0 : index
    %c1_21 = arith.constant 1 : index
    %c9_22 = arith.constant 9 : index
    %c0_23 = arith.constant 0 : index
    %14 = vector.load %arg9[%c0_20, %c1_21, %c9_22, %c0_23] : memref<2x10x10x128xf32, #tpu.memory_space<vmem>>, vector<2x8x1x128xf32>
    tpu.vector_store %arg9[%c0_20, %c1_21, %c9_22, %c0_23], %10 {strides = array<i32>} : memref<2x10x10x128xf32, #tpu.memory_space<vmem>>, vector<2x8x1x128xf32>,
    %15 = vector.shape_cast %8 : vector<128x128xf32> to vector<2x8x8x128xf32>
    %c0_24 = arith.constant 0 : index
    %c1_25 = arith.constant 1 : index
    %c1_26 = arith.constant 1 : index
    %c0_27 = arith.constant 0 : index
    %16 = vector.load %arg9[%c0_24, %c1_25, %c1_26, %c0_27] : memref<2x10x10x128xf32, #tpu.memory_space<vmem>>, vector<2x8x8x128xf32>
    tpu.vector_store %arg9[%c0_24, %c1_25, %c1_26, %c0_27], %15 {strides = array<i32>} : memref<2x10x10x128xf32, #tpu.memory_space<vmem>>, vector<2x8x8x128xf32>,
    %c0_28 = arith.constant 0 : index
    %c0_29 = arith.constant 0 : index
    %c0_30 = arith.constant 0 : index
    %c0_31 = arith.constant 0 : index
    %17 = vector.load %arg9[%c0_28, %c0_29, %c0_30, %c0_31] : memref<2x10x10x128xf32, #tpu.memory_space<vmem>>, vector<2x8x8x128xf32>
    %18 = vector.shape_cast %17 : vector<2x8x8x128xf32> to vector<128x128xf32>
    %c0_32 = arith.constant 0 : index
    %c0_33 = arith.constant 0 : index
    %c1_34 = arith.constant 1 : index
    %c0_35 = arith.constant 0 : index
    %19 = vector.load %arg9[%c0_32, %c0_33, %c1_34, %c0_35] : memref<2x10x10x128xf32, #tpu.memory_space<vmem>>, vector<2x8x8x128xf32>
    %20 = vector.shape_cast %19 : vector<2x8x8x128xf32> to vector<128x128xf32>
    %c0_36 = arith.constant 0 : index
    %c0_37 = arith.constant 0 : index
    %c2 = arith.constant 2 : index
    %c0_38 = arith.constant 0 : index
    %21 = vector.load %arg9[%c0_36, %c0_37, %c2, %c0_38] : memref<2x10x10x128xf32, #tpu.memory_space<vmem>>, vector<2x8x8x128xf32>
    %22 = vector.shape_cast %21 : vector<2x8x8x128xf32> to vector<128x128xf32>
    %c0_39 = arith.constant 0 : index
    %c1_40 = arith.constant 1 : index
    %c0_41 = arith.constant 0 : index
    %c0_42 = arith.constant 0 : index
    %23 = vector.load %arg9[%c0_39, %c1_40, %c0_41, %c0_42] : memref<2x10x10x128xf32, #tpu.memory_space<vmem>>, vector<2x8x8x128xf32>
    %24 = vector.shape_cast %23 : vector<2x8x8x128xf32> to vector<128x128xf32>
    %c0_43 = arith.constant 0 : index
    %c1_44 = arith.constant 1 : index
    %c1_45 = arith.constant 1 : index
    %c0_46 = arith.constant 0 : index
    %25 = vector.load %arg9[%c0_43, %c1_44, %c1_45, %c0_46] : memref<2x10x10x128xf32, #tpu.memory_space<vmem>>, vector<2x8x8x128xf32>
    %26 = vector.shape_cast %25 : vector<2x8x8x128xf32> to vector<128x128xf32>
    %c0_47 = arith.constant 0 : index
    %c1_48 = arith.constant 1 : index
    %c2_49 = arith.constant 2 : index
    %c0_50 = arith.constant 0 : index
    %27 = vector.load %arg9[%c0_47, %c1_48, %c2_49, %c0_50] : memref<2x10x10x128xf32, #tpu.memory_space<vmem>>, vector<2x8x8x128xf32>
    %28 = vector.shape_cast %27 : vector<2x8x8x128xf32> to vector<128x128xf32>
    %c0_51 = arith.constant 0 : index
    %c2_52 = arith.constant 2 : index
    %c0_53 = arith.constant 0 : index
    %c0_54 = arith.constant 0 : index
    %29 = vector.load %arg9[%c0_51, %c2_52, %c0_53, %c0_54] : memref<2x10x10x128xf32, #tpu.memory_space<vmem>>, vector<2x8x8x128xf32>
    %30 = vector.shape_cast %29 : vector<2x8x8x128xf32> to vector<128x128xf32>
    %c0_55 = arith.constant 0 : index
    %c2_56 = arith.constant 2 : index
    %c1_57 = arith.constant 1 : index
    %c0_58 = arith.constant 0 : index
    %31 = vector.load %arg9[%c0_55, %c2_56, %c1_57, %c0_58] : memref<2x10x10x128xf32, #tpu.memory_space<vmem>>, vector<2x8x8x128xf32>
    %32 = vector.shape_cast %31 : vector<2x8x8x128xf32> to vector<128x128xf32>
    %c0_59 = arith.constant 0 : index
    %c2_60 = arith.constant 2 : index
    %c2_61 = arith.constant 2 : index
    %c0_62 = arith.constant 0 : index
    %33 = vector.load %arg9[%c0_59, %c2_60, %c2_61, %c0_62] : memref<2x10x10x128xf32, #tpu.memory_space<vmem>>, vector<2x8x8x128xf32>
    %34 = vector.shape_cast %33 : vector<2x8x8x128xf32> to vector<128x128xf32>
    %35 = tpu.concatenate %18, %20, %22, %24, %26, %28, %30, %32, %34 in 1 : vector<128x128xf32>, vector<128x128xf32>, vector<128x128xf32>, vector<128x128xf32>, vector<128x128xf32>, vector<128x128xf32>, vector<128x128xf32>, vector<128x128xf32>, vector<128x128xf32> -> vector<128x1152xf32>
    %c0_63 = arith.constant 0 : index
    %c0_64 = arith.constant 0 : index
    %36 = vector.load %arg4[%c0_63, %c0_64] : memref<1152x128xf32, #tpu.memory_space<vmem>>, vector<1152x128xf32>
    %cst_65 = arith.constant dense<0.000000e+00> : vector<128x128xf32>
    %37 = tpu.matmul %35, %36, %cst_65 {dimension_numbers = #tpu.dot_dimension_numbers<[1], [0], [0], [1], [0, 0, 1, 1], [], []>} : vector<128x1152xf32>, vector<1152x128xf32>, vector<128x128xf32> -> vector<128x128xf32>
    %c0_66 = arith.constant 0 : index
    %c0_67 = arith.constant 0 : index
    %38 = vector.load %arg5[%c0_66, %c0_67] : memref<1x128xf32, #tpu.memory_space<vmem>>, vector<1x128xf32>
    %39 = vector.broadcast %38 : vector<1x128xf32> to vector<128x128xf32>
    %40 = arith.addf %37, %39 : vector<128x128xf32>
    %cst_68 = arith.constant 0.000000e+00 : f32
    %41 = vector.broadcast %cst_68 : f32 to vector<128x128xf32>
    %42 = arith.maximumf %40, %41 : vector<128x128xf32>
    %c0_69 = arith.constant 0 : index
    %c0_70 = arith.constant 0 : index
    %43 = vector.load %arg6[%c0_69, %c0_70] : memref<128x128xf32, #tpu.memory_space<vmem>>, vector<128x128xf32>
    %cst_71 = arith.constant dense<0.000000e+00> : vector<128x128xf32>
    %44 = tpu.matmul %42, %43, %cst_71 {dimension_numbers = #tpu.dot_dimension_numbers<[1], [0], [0], [1], [0, 0, 1, 1], [], []>} : vector<128x128xf32>, vector<128x128xf32>, vector<128x128xf32> -> vector<128x128xf32>
    %c0_72 = arith.constant 0 : index
    %c0_73 = arith.constant 0 : index
    %45 = vector.load %arg7[%c0_72, %c0_73] : memref<1x128xf32, #tpu.memory_space<vmem>>, vector<1x128xf32>
    %46 = vector.broadcast %45 : vector<1x128xf32> to vector<128x128xf32>
    %47 = arith.addf %44, %46 : vector<128x128xf32>
    %48 = arith.addf %47, %1 : vector<128x128xf32>
    %cst_74 = arith.constant 0.000000e+00 : f32
    %49 = vector.broadcast %cst_74 : f32 to vector<128x128xf32>
    %50 = arith.maximumf %48, %49 : vector<128x128xf32>
    %51 = vector.shape_cast %50 : vector<128x128xf32> to vector<2x8x8x128xf32>
    %c0_75 = arith.constant 0 : index
    %c0_76 = arith.constant 0 : index
    %c0_77 = arith.constant 0 : index
    %c0_78 = arith.constant 0 : index
    %52 = vector.load %arg8[%c0_75, %c0_76, %c0_77, %c0_78] : memref<2x8x8x128xf32, #tpu.memory_space<vmem>>, vector<2x8x8x128xf32>
    tpu.vector_store %arg8[%c0_75, %c0_76, %c0_77, %c0_78], %51 {strides = array<i32>} : memref<2x8x8x128xf32, #tpu.memory_space<vmem>>, vector<2x8x8x128xf32>,
    return
  }
  func.func @transform_0(%arg0: i32) -> (i32, i32, i32, i32) {
    %c0_i32 = arith.constant 0 : i32
    %c0_i32_0 = arith.constant 0 : i32
    %c0_i32_1 = arith.constant 0 : i32
    %c0_i32_2 = arith.constant 0 : i32
    return %arg0, %c0_i32, %c0_i32_0, %c0_i32_1 : i32, i32, i32, i32
  }
  func.func @transform_1(%arg0: i32) -> (i32, i32) {
    %c0_i32 = arith.constant 0 : i32
    %c0_i32_0 = arith.constant 0 : i32
    %c0_i32_1 = arith.constant 0 : i32
    return %c0_i32, %c0_i32_0 : i32, i32
  }
  func.func @transform_2(%arg0: i32) -> (i32, i32) {
    %c0_i32 = arith.constant 0 : i32
    %c0_i32_0 = arith.constant 0 : i32
    %c0_i32_1 = arith.constant 0 : i32
    return %c0_i32, %c0_i32_0 : i32, i32
  }
  func.func @transform_3(%arg0: i32) -> (i32, i32) {
    %c0_i32 = arith.constant 0 : i32
    %c0_i32_0 = arith.constant 0 : i32
    %c0_i32_1 = arith.constant 0 : i32
    return %c0_i32, %c0_i32_0 : i32, i32
  }
  func.func @transform_4(%arg0: i32) -> (i32, i32) {
    %c0_i32 = arith.constant 0 : i32
    %c0_i32_0 = arith.constant 0 : i32
    %c0_i32_1 = arith.constant 0 : i32
    return %c0_i32, %c0_i32_0 : i32, i32
  }
  func.func @transform_5(%arg0: i32) -> (i32, i32) {
    %c0_i32 = arith.constant 0 : i32
    %c0_i32_0 = arith.constant 0 : i32
    %c0_i32_1 = arith.constant 0 : i32
    return %c0_i32, %c0_i32_0 : i32, i32
  }
  func.func @transform_6(%arg0: i32) -> (i32, i32) {
    %c0_i32 = arith.constant 0 : i32
    %c0_i32_0 = arith.constant 0 : i32
    %c0_i32_1 = arith.constant 0 : i32
    return %c0_i32, %c0_i32_0 : i32, i32
  }
  func.func @transform_7(%arg0: i32) -> (i32, i32, i32, i32) {
    %c0_i32 = arith.constant 0 : i32
    %c0_i32_0 = arith.constant 0 : i32
    %c0_i32_1 = arith.constant 0 : i32
    %c0_i32_2 = arith.constant 0 : i32
    return %arg0, %c0_i32, %c0_i32_0, %c0_i32_1 : i32, i32, i32, i32
  }
}

</mosaic_0001>

<bundles_post_ra>
// kernel: tpu_custom_call.1
= control target key start
LH: loop header
LB: loop body
LE: loop exit
PB: predicated region body
PF: predicated region fallthrough
CT: control target
= control target key end

     0   :  { %12 = vsyncpa [#allocation4], 0  ;;  %s2094_s0 = inlined_call_operand.hbm [shape: f32[2,8,8,128], index: 0, kind: input, shape index: {}]   ;;  %s2095_s1 = inlined_call_operand.hbm [shape: f32[128,128], index: 1, kind: input, shape index: {}]   ;;  %s2096_s2 = inlined_call_operand.vmem [shape: f32[1,128], index: 2, kind: input, shape index: {}]   ;;  %s2097_s3 = inlined_call_operand.hbm [shape: f32[1152,128], index: 3, kind: input, shape index: {}]   ;;  %s2098_s4 = inlined_call_operand.vmem [shape: f32[1,128], index: 4, kind: input, shape index: {}]   ;;  %s2099_s5 = inlined_call_operand.hbm [shape: f32[128,128], index: 5, kind: input, shape index: {}]   ;;  %s2100_s6 = inlined_call_operand.vmem [shape: f32[1,128], index: 6, kind: input, shape index: {}]   ;;  %s2101_s7 = inlined_call_operand.hbm [shape: f32[2,8,8,128], index: 7, kind: output, shape index: {}]  }
   0x1   :  { %13 = vsyncpa [#allocation7], 0 }
   0x2   :  { %14 = vsyncpa [#allocation10], 0 }
   0x3   :  { %15 = vsyncpa [#allocation5], 0  ;;  %s33_s26 = sshll.u32 %s2095_s1, 4  ;;  %s1517_s27 = smov [#allocation6]   ;;  %s34_s26 = int_to_ptr.hbm [resolvable:$true] %s33_s26 }
   0x4   :  { %s35_s28 = sshll.u32 %s1517_s27, 4  ;;  %s20_s8 = sshll.u32 %s2094_s0, 4  ;;  %s36_s28 = int_to_ptr.vmem [resolvable:$true] %s35_s28  ;;  %s21_s8 = int_to_ptr.hbm [resolvable:$true] %s20_s8 }
   0x5   :  { %s1518_s9 = smov 128   ;;  %s1519_s10 = smov 8  }
   0x6   :  { %41 = dma.hbm_to_vmem [thread:$0]  %s34_s26, 2048, %s36_s28, [#allocation7], %s1518_s9, %s1518_s9, %s1519_s10  }
   0x7   :  { %s1520_s11 = smov [#allocation3]   ;;  %s48_s1 = sshll.u32 %s2097_s3, 4  ;;  %s49_s1 = int_to_ptr.hbm [resolvable:$true] %s48_s1 }
   0x8   :  { %s22_s12 = sshll.u32 %s1520_s11, 4  ;;  %s63_s16 = sshll.u32 %s2099_s5, 4  ;;  %s23_s12 = int_to_ptr.vmem [resolvable:$true] %s22_s12  ;;  %s64_s16 = int_to_ptr.hbm [resolvable:$true] %s63_s16 }
   0x9   :  { %28 = dma.hbm_to_vmem [thread:$0]  %s21_s8, 2048, %s23_s12, [#allocation4], %s1518_s9, %s1518_s9, %s1519_s10  }
   0xa   :  { %s1521_s17 = smov [#allocation8]   ;;  %s1522_s19 = smov [#allocation9]  }
   0xb   :  { %s50_s18 = sshll.u32 %s1521_s17, 4  ;;  %s65_s3 = sshll.u32 %s1522_s19, 4  ;;  %s51_s18 = int_to_ptr.vmem [resolvable:$true] %s50_s18  ;;  %s66_s3 = int_to_ptr.vmem [resolvable:$true] %s65_s3 }
   0xc   :  { %56 = dma.hbm_to_vmem [thread:$0]  %s49_s1, 18432, %s51_s18, [#allocation7], %s1518_s9, %s1518_s9, %s1519_s10  }
   0xd   :  { %71 = dma.hbm_to_vmem [thread:$0]  %s64_s16, 2048, %s66_s3, [#allocation10], %s1518_s9, %s1518_s9, %s1519_s10  }
   0xe   :  { %1509 = dma.done.wait [#allocation4], 2048  }
   0xf   :  { %1510 = vsyncadd [#allocation4], 4294965248 }
  0x10   :  { %1511 = dma.done.wait [#allocation7], 20480  }
  0x11   :  { %1512 = vsyncadd [#allocation7], 4294946816 }
  0x12   :  { %1513 = dma.done.wait [#allocation10], 2048  }
  0x13   :  { %1514 = vsyncadd [#allocation10], 4294965248  ;;  %v121_v0 = vld [vmem:[#allocation6 + $0x78] sm:$0xff]  ;;  %v120_v1 = vld [vmem:[#allocation6 + $0x70] sm:$0xff]  ;;  %v1523_v58 = vmov 0.0   ;;  %s1298_s26 = sshll.u32 %s2101_s7, 4  ;;  %s1299_s26 = int_to_ptr.hbm [resolvable:$true] %s1298_s26 }
  0x14   :  { %126 = vmatpush.msra.mxu0 %v121_v0  ;;  %1313 = vmatpush.msra.mxu3 %v121_v0  ;;  %v119_v2 = vld [vmem:[#allocation6 + $0x68] sm:$0xff]  ;;  %v118_v3 = vld [vmem:[#allocation6 + $0x60] sm:$0xff]  ;;  %v117_v4 = vld [vmem:[#allocation6 + $0x58] sm:$0xff]  ;;  %207 = vst [vmem:[#allocation2] sm:$0xff] %v1523_v58 }
  0x15   :  { %v116_v5 = vld [vmem:[#allocation6 + $0x50] sm:$0xff]  ;;  %v115_v6 = vld [vmem:[#allocation6 + $0x48] sm:$0xff]  ;;  %v114_v7 = vld [vmem:[#allocation6 + $0x40] sm:$0xff]  ;;  %208 = vst [vmem:[#allocation2 + $0x8] sm:$0x3] %v1523_v58 }
  0x16   :  { %127 = vmatpush.msra.mxu0 %v120_v1  ;;  %1314 = vmatpush.msra.mxu3 %v120_v1  ;;  %v113_v8 = vld [vmem:[#allocation6 + $0x38] sm:$0xff]  ;;  %v112_v9 = vld [vmem:[#allocation6 + $0x30] sm:$0xff]  ;;  %v111_v10 = vld [vmem:[#allocation6 + $0x28] sm:$0xff]  ;;  %209 = vst [vmem:[#allocation2 + $0xa0] sm:$0xff] %v1523_v58 }
  0x17   :  { %v110_v11 = vld [vmem:[#allocation6 + $0x20] sm:$0xff]  ;;  %v109_v12 = vld [vmem:[#allocation6 + $0x18] sm:$0xff]  ;;  %v108_v13 = vld [vmem:[#allocation6 + $0x10] sm:$0xff]  ;;  %210 = vst [vmem:[#allocation2 + $0xa8] sm:$0x3] %v1523_v58 }
  0x18   :  { %128 = vmatpush.msra.mxu0 %v119_v2  ;;  %1315 = vmatpush.msra.mxu3 %v119_v2  ;;  %v107_v14 = vld [vmem:[#allocation6 + $0x8] sm:$0xff]  ;;  %v106_v15 = vld [vmem:[#allocation6] sm:$0xff]  ;;  %v92_v20 = vld [vmem:[#allocation3 + $0x10] sm:$0xff]  ;;  %212 = vst [vmem:[#allocation2 + $0x90] sm:$0xff] %v1523_v58 }
  0x19   :  { %v90_v16 = vld [vmem:[#allocation3] sm:$0xff]  ;;  %v91_v18 = vld [vmem:[#allocation3 + $0x8] sm:$0xff]  ;;  %v96_v21 = vld [vmem:[#allocation3 + $0x30] sm:$0xff]  ;;  %213 = vst [vmem:[#allocation2 + $0x98] sm:$0x3] %v1523_v58 }
  0x1a   :  { %129 = vmatpush.msra.mxu0 %v118_v3  ;;  %1316 = vmatpush.msra.mxu3 %v118_v3  ;;  %v94_v17 = vld [vmem:[#allocation3 + $0x20] sm:$0xff]  ;;  %v95_v19 = vld [vmem:[#allocation3 + $0x28] sm:$0xff]  ;;  %v93_v22 = vld [vmem:[#allocation3 + $0x18] sm:$0xff]  ;;  %214 = vst [vmem:[#allocation2 + $0x130] sm:$0xff] %v1523_v58 }
  0x1b   :  { %v97_v23 = vld [vmem:[#allocation3 + $0x38] sm:$0xff]  ;;  %v98_v24 = vld [vmem:[#allocation3 + $0x40] sm:$0xff]  ;;  %v99_v25 = vld [vmem:[#allocation3 + $0x48] sm:$0xff]  ;;  %215 = vst [vmem:[#allocation2 + $0x138] sm:$0x3] %v1523_v58 }
  0x1c   :  { %130 = vmatpush.msra.mxu0 %v117_v4  ;;  %1317 = vmatpush.msra.mxu3 %v117_v4  ;;  %v425_v26 = vld [vmem:[#allocation8 + $0x78] sm:$0xff]  ;;  %v424_v28 = vld [vmem:[#allocation8 + $0x70] sm:$0xff]  ;;  %v423_v30 = vld [vmem:[#allocation8 + $0x68] sm:$0xff]  ;;  %217 = vst [vmem:[#allocation2 + $0x10] sm:$0x1] %v1523_v58 }
  0x1d   :  { %v457_v27 = vld [vmem:[#allocation8 + $0x178] sm:$0xff]  ;;  %v456_v29 = vld [vmem:[#allocation8 + $0x170] sm:$0xff]  ;;  %v455_v31 = vld [vmem:[#allocation8 + $0x168] sm:$0xff]  ;;  %1329 = vmatpush.msra.mxu1 %v425_v26  ;;  %218 = vst [vmem:[#allocation2 + $0x20] sm:$0x1] %v1523_v58 }
  0x1e   :  { %131 = vmatpush.msra.mxu0 %v116_v5  ;;  %1318 = vmatpush.msra.mxu3 %v116_v5  ;;  %v422_v32 = vld [vmem:[#allocation8 + $0x60] sm:$0xff]  ;;  %v100_v34 = vld [vmem:[#allocation3 + $0x50] sm:$0xff]  ;;  %v421_v35 = vld [vmem:[#allocation8 + $0x58] sm:$0xff]  ;;  %219 = vst [vmem:[#allocation2 + $0x30] sm:$0x1] %v1523_v58 }
  0x1f   :  { %v454_v33 = vld [vmem:[#allocation8 + $0x160] sm:$0xff]  ;;  %1330 = vmatpush.msra.mxu1 %v424_v28  ;;  %v453_v36 = vld [vmem:[#allocation8 + $0x158] sm:$0xff]  ;;  %v420_v37 = vld [vmem:[#allocation8 + $0x50] sm:$0xff]  ;;  %220 = vst [vmem:[#allocation2 + $0x40] sm:$0x1] %v1523_v58 }
  0x20   :  { %132 = vmatpush.msra.mxu0 %v115_v6  ;;  %1319 = vmatpush.msra.mxu3 %v115_v6  ;;  %v452_v38 = vld [vmem:[#allocation8 + $0x150] sm:$0xff]  ;;  %v419_v39 = vld [vmem:[#allocation8 + $0x48] sm:$0xff]  ;;  %v418_v41 = vld [vmem:[#allocation8 + $0x40] sm:$0xff]  ;;  %221 = vst [vmem:[#allocation2 + $0x50] sm:$0x1] %v1523_v58 }
  0x21   :  { %1331 = vmatpush.msra.mxu1 %v423_v30  ;;  %v451_v40 = vld [vmem:[#allocation8 + $0x148] sm:$0xff]  ;;  %v450_v42 = vld [vmem:[#allocation8 + $0x140] sm:$0xff]  ;;  %v101_v43 = vld [vmem:[#allocation3 + $0x58] sm:$0xff]  ;;  %222 = vst [vmem:[#allocation2 + $0x60] sm:$0x1] %v1523_v58 }
  0x22   :  { %133 = vmatpush.msra.mxu0 %v114_v7  ;;  %1320 = vmatpush.msra.mxu3 %v114_v7  ;;  %v417_v44 = vld [vmem:[#allocation8 + $0x38] sm:$0xff]  ;;  %v416_v46 = vld [vmem:[#allocation8 + $0x30] sm:$0xff]  ;;  %v415_v48 = vld [vmem:[#allocation8 + $0x28] sm:$0xff]  ;;  %223 = vst [vmem:[#allocation2 + $0x70] sm:$0x1] %v1523_v58 }
  0x23   :  { %1332 = vmatpush.msra.mxu1 %v422_v32  ;;  %v449_v45 = vld [vmem:[#allocation8 + $0x138] sm:$0xff]  ;;  %v448_v47 = vld [vmem:[#allocation8 + $0x130] sm:$0xff]  ;;  %v447_v49 = vld [vmem:[#allocation8 + $0x128] sm:$0xff]  ;;  %224 = vst [vmem:[#allocation2 + $0x80] sm:$0x1] %v1523_v58 }
  0x24   :  { %134 = vmatpush.msra.mxu0 %v113_v8  ;;  %1321 = vmatpush.msra.mxu3 %v113_v8  ;;  %v414_v50 = vld [vmem:[#allocation8 + $0x20] sm:$0xff]  ;;  %v413_v53 = vld [vmem:[#allocation8 + $0x18] sm:$0xff]  ;;  %v103_v55 = vld [vmem:[#allocation3 + $0x68] sm:$0xff]  ;;  %225 = vst [vmem:[#allocation2 + $0xb0] sm:$0x1] %v1523_v58 }
  0x25   :  { %1333 = vmatpush.msra.mxu1 %v421_v35  ;;  %v446_v51 = vld [vmem:[#allocation8 + $0x120] sm:$0xff]  ;;  %v445_v54 = vld [vmem:[#allocation8 + $0x118] sm:$0xff]  ;;  %v104_v56 = vld [vmem:[#allocation3 + $0x70] sm:$0xff]  ;;  %226 = vst [vmem:[#allocation2 + $0xc0] sm:$0x1] %v1523_v58 }
  0x26   :  { %135 = vmatpush.msra.mxu0 %v112_v9  ;;  %1322 = vmatpush.msra.mxu3 %v112_v9  ;;  %v102_v52 = vld [vmem:[#allocation3 + $0x60] sm:$0xff]  ;;  %v105_v57 = vld [vmem:[#allocation3 + $0x78] sm:$0xff]  ;;  %v412_v60 = vld [vmem:[#allocation8 + $0x10] sm:$0xff]  ;;  %227 = vst [vmem:[#allocation2 + $0xd0] sm:$0x1] %v1523_v58 }
  0x27   :  { %1334 = vmatpush.msra.mxu1 %v420_v37  ;;  %v441_v59 = vld [vmem:[#allocation8 + $0xf8] sm:$0xff]  ;;  %v444_v61 = vld [vmem:[#allocation8 + $0x110] sm:$0xff]  ;;  %v411_v63 = vld [vmem:[#allocation8 + $0x8] sm:$0xff]  ;;  %228 = vst [vmem:[#allocation2 + $0xe0] sm:$0x1] %v1523_v58 }
  0x28   :  { %136 = vmatpush.msra.mxu0 %v111_v10  ;;  %1323 = vmatpush.msra.mxu3 %v111_v10  ;;  %v440_v62 = vld [vmem:[#allocation8 + $0xf0] sm:$0xff]  ;;  %v443_v0 = vld [vmem:[#allocation8 + $0x108] sm:$0xff]  ;;  %v410_v2 = vld [vmem:[#allocation8] sm:$0xff]  ;;  %229 = vst [vmem:[#allocation2 + $0xf0] sm:$0x1] %v1523_v58 }
  0x29   :  { %1335 = vmatpush.msra.mxu1 %v419_v39  ;;  %1345 = vmatpush.msra.mxu2 %v441_v59  ;;  %v439_v1 = vld [vmem:[#allocation8 + $0xe8] sm:$0xff]  ;;  %v442_v3 = vld [vmem:[#allocation8 + $0x100] sm:$0xff]  ;;  %v437_v6 = vld [vmem:[#allocation8 + $0xd8] sm:$0xff]  ;;  %230 = vst [vmem:[#allocation2 + $0x100] sm:$0x1] %v1523_v58 }
  0x2a   :  { %137 = vmatpush.msra.mxu0 %v110_v11  ;;  %1324 = vmatpush.msra.mxu3 %v110_v11  ;;  %v438_v4 = vld [vmem:[#allocation8 + $0xe0] sm:$0xff]  ;;  %v436_v7 = vld [vmem:[#allocation8 + $0xd0] sm:$0xff]  ;;  %v435_v8 = vld [vmem:[#allocation8 + $0xc8] sm:$0xff]  ;;  %231 = vst [vmem:[#allocation2 + $0x110] sm:$0x1] %v1523_v58 }
  0x2b   :  { %1336 = vmatpush.msra.mxu1 %v418_v41  ;;  %1346 = vmatpush.msra.mxu2 %v440_v62  ;;  %v297_v5 = vld [vmem:[#allocation2 + $0x2] sm:$0xff]  ;;  %v433_v10 = vld [vmem:[#allocation8 + $0xb8] sm:$0xff]  ;;  %v432_v11 = vld [vmem:[#allocation8 + $0xb0] sm:$0xff]  ;;  %232 = vst [vmem:[#allocation2 + $0x120] sm:$0x1] %v1523_v58 }
  0x2c   :  { %138 = vmatpush.msra.mxu0 %v109_v12  ;;  %1325 = vmatpush.msra.mxu3 %v109_v12  ;;  %v434_v9 = vld [vmem:[#allocation8 + $0xc0] sm:$0xff]  ;;  %v431_v12 = vld [vmem:[#allocation8 + $0xa8] sm:$0xff]  ;;  %233 = vst [vmem:[#allocation2 + $0x19] sm:$0x1] %v1523_v58 }
  0x2d   :  { %1337 = vmatpush.msra.mxu1 %v417_v44  ;;  %1347 = vmatpush.msra.mxu2 %v439_v1  ;;  %234 = vst [vmem:[#allocation2 + $0x29] sm:$0x1] %v1523_v58 }
  0x2e   :  { %139 = vmatpush.msra.mxu0 %v108_v13  ;;  %1326 = vmatpush.msra.mxu3 %v108_v13  ;;  %v430_v13 = vld [vmem:[#allocation8 + $0xa0] sm:$0xff]  ;;  %235 = vst [vmem:[#allocation2 + $0x39] sm:$0x1] %v1523_v58 }
  0x2f   :  { %1338 = vmatpush.msra.mxu1 %v416_v46  ;;  %1348 = vmatpush.msra.mxu2 %v438_v4  ;;  %236 = vst [vmem:[#allocation2 + $0x49] sm:$0x1] %v1523_v58 }
  0x30   :  { %140 = vmatpush.msra.mxu0 %v107_v14  ;;  %1327 = vmatpush.msra.mxu3 %v107_v14  ;;  %v429_v14 = vld [vmem:[#allocation8 + $0x98] sm:$0xff]  ;;  %237 = vst [vmem:[#allocation2 + $0x59] sm:$0x1] %v1523_v58 }
  0x31   :  { %1339 = vmatpush.msra.mxu1 %v415_v48  ;;  %1349 = vmatpush.msra.mxu2 %v437_v6  ;;  %238 = vst [vmem:[#allocation2 + $0x69] sm:$0x1] %v1523_v58 }
  0x32   :  { %141 = vmatpush.msra.mxu0 %v106_v15  ;;  %1328 = vmatpush.msra.mxu3 %v106_v15  ;;  %v428_v15 = vld [vmem:[#allocation8 + $0x90] sm:$0xff]  ;;  %239 = vst [vmem:[#allocation2 + $0x79] sm:$0x1] %v1523_v58 }
  0x33   :  { %142 = vmatmul.f32.vlgmr.msra.gmra.mxu0 %v90_v16  ;;  %154 = vmatmul.f32.vlgmr.msra.gmra.mxu3 %v94_v17  ;;  %v427_v16 = vld [vmem:[#allocation8 + $0x88] sm:$0xff]  ;;  %v426_v17 = vld [vmem:[#allocation8 + $0x80] sm:$0xff]  ;;  %240 = vst [vmem:[#allocation2 + $0x89] sm:$0x1] %v1523_v58 }
  0x34   :  { %558 = vmatpush.msrb.mxu0 %v425_v26  ;;  %688 = vmatpush.msrb.mxu3 %v457_v27  ;;  %241 = vst [vmem:[#allocation2 + $0xb9] sm:$0x1] %v1523_v58  ;;  %v488_v27 = vld [vmem:[#allocation8 + $0x270] sm:$0xff] }
  0x35   :  { %1340 = vmatpush.msra.mxu1 %v414_v50  ;;  %1350 = vmatpush.msra.mxu2 %v436_v7  ;;  %242 = vst [vmem:[#allocation2 + $0xc9] sm:$0x1] %v1523_v58 }
  0x36   :  { %559 = vmatpush.msrb.mxu0 %v424_v28  ;;  %689 = vmatpush.msrb.mxu3 %v456_v29  ;;  %243 = vst [vmem:[#allocation2 + $0xd9] sm:$0x1] %v1523_v58  ;;  %v471_v29 = vld [vmem:[#allocation8 + $0x1e8] sm:$0xff] }
  0x37   :  { %1341 = vmatpush.msra.mxu1 %v413_v53  ;;  %1351 = vmatpush.msra.mxu2 %v435_v8  ;;  %244 = vst [vmem:[#allocation2 + $0xe9] sm:$0x1] %v1523_v58 }
  0x38   :  { %560 = vmatpush.msrb.mxu0 %v423_v30  ;;  %690 = vmatpush.msrb.mxu3 %v455_v31  ;;  %245 = vst [vmem:[#allocation2 + $0xf9] sm:$0x1] %v1523_v58 }
  0x39   :  { %1342 = vmatpush.msra.mxu1 %v412_v60  ;;  %1352 = vmatpush.msra.mxu2 %v434_v9  ;;  %246 = vst [vmem:[#allocation2 + $0x109] sm:$0x1] %v1523_v58 }
  0x3a   :  { %561 = vmatpush.msrb.mxu0 %v422_v32  ;;  %691 = vmatpush.msrb.mxu3 %v454_v33  ;;  %247 = vst [vmem:[#allocation2 + $0x119] sm:$0x1] %v1523_v58  ;;  %v470_v33 = vld [vmem:[#allocation8 + $0x1e0] sm:$0xff] }
  0x3b   :  { %145 = vmatmul.f32.gmra.mxu0 %v91_v18  ;;  %157 = vmatmul.f32.gmra.mxu3 %v95_v19  ;;  %v1625_v18 = vld [vmem:[%s2096_s2] ss:$0 sm:$0xff]  ;;  %248 = vst [vmem:[#allocation2 + $0x129] sm:$0x1] %v1523_v58 }
  0x3c   :  { %562 = vmatpush.msrb.mxu0 %v421_v35  ;;  %692 = vmatpush.msrb.mxu3 %v453_v36 }
  0x3d   :  { %1343 = vmatpush.msra.mxu1 %v411_v63  ;;  %1353 = vmatpush.msra.mxu2 %v433_v10 }
  0x3e   :  { %563 = vmatpush.msrb.mxu0 %v420_v37  ;;  %693 = vmatpush.msrb.mxu3 %v452_v38  ;;  %v469_v37 = vld [vmem:[#allocation8 + $0x1d8] sm:$0xff]  ;;  %v487_v38 = vld [vmem:[#allocation8 + $0x268] sm:$0xff] }
  0x3f   :  { %1344 = vmatpush.msra.mxu1 %v410_v2  ;;  %1354 = vmatpush.msra.mxu2 %v432_v11 }
  0x40   :  { %564 = vmatpush.msrb.mxu0 %v419_v39  ;;  %694 = vmatpush.msrb.mxu3 %v451_v40  ;;  %v468_v40 = vld [vmem:[#allocation8 + $0x1d0] sm:$0xff] }
  0x41   :  { %1355 = vmatpush.msra.mxu2 %v431_v12 }
  0x42   :  { %565 = vmatpush.msrb.mxu0 %v418_v41  ;;  %695 = vmatpush.msrb.mxu3 %v450_v42 }
  0x43   :  { %148 = vmatmul.f32.gmra.mxu0 %v92_v20  ;;  %160 = vmatmul.f32.gmra.mxu3 %v96_v21 }
  0x44   :  { %566 = vmatpush.msrb.mxu0 %v417_v44  ;;  %696 = vmatpush.msrb.mxu3 %v449_v45  ;;  %v467_v44 = vld [vmem:[#allocation8 + $0x1c8] sm:$0xff] }
  0x45   :  { %1356 = vmatpush.msra.mxu2 %v430_v13 }
  0x46   :  { %567 = vmatpush.msrb.mxu0 %v416_v46  ;;  %697 = vmatpush.msrb.mxu3 %v448_v47  ;;  %v466_v46 = vld [vmem:[#allocation8 + $0x1c0] sm:$0xff] }
  0x47   :  { %1357 = vmatpush.msra.mxu2 %v429_v14 }
  0x48   :  { %568 = vmatpush.msrb.mxu0 %v415_v48  ;;  %698 = vmatpush.msrb.mxu3 %v447_v49 }
  0x49   :  { %1358 = vmatpush.msra.mxu2 %v428_v15 }
  0x4a   :  { %569 = vmatpush.msrb.mxu0 %v414_v50  ;;  %699 = vmatpush.msrb.mxu3 %v446_v51  ;;  %v465_v50 = vld [vmem:[#allocation8 + $0x1b8] sm:$0xff]  ;;  %v486_v51 = vld [vmem:[#allocation8 + $0x260] sm:$0xff] }
  0x4b   :  { %151 = vmatmul.f32.gmra.mxu0 %v93_v22  ;;  %163 = vmatmul.f32.gmra.mxu3 %v97_v23  ;;  %v489_v23 = vld [vmem:[#allocation8 + $0x278] sm:$0xff] }
  0x4c   :  { %570 = vmatpush.msrb.mxu0 %v413_v53  ;;  %700 = vmatpush.msrb.mxu3 %v445_v54  ;;  %v464_v53 = vld [vmem:[#allocation8 + $0x1b0] sm:$0xff] }
  0x4d   :  { %1359 = vmatpush.msra.mxu2 %v427_v16  ;;  %818 = vmatpush.msrb.mxu1 %v489_v23 }
  0x4e   :  { %571 = vmatpush.msrb.mxu0 %v412_v60  ;;  %701 = vmatpush.msrb.mxu3 %v444_v61  ;;  %v462_v60 = vld [vmem:[#allocation8 + $0x1a0] sm:$0xff] }
  0x4f   :  { %1360 = vmatpush.msra.mxu2 %v426_v17  ;;  %819 = vmatpush.msrb.mxu1 %v488_v27  ;;  %v480_v27 = vld [vmem:[#allocation8 + $0x230] sm:$0xff] }
  0x50   :  { %572 = vmatpush.msrb.mxu0 %v411_v63  ;;  %702 = vmatpush.msrb.mxu3 %v443_v0  ;;  %v485_v0 = vld [vmem:[#allocation8 + $0x258] sm:$0xff] }
  0x51   :  { %820 = vmatpush.msrb.mxu1 %v487_v38  ;;  %v479_v38 = vld [vmem:[#allocation8 + $0x228] sm:$0xff] }
  0x52   :  { %573 = vmatpush.msrb.mxu0 %v410_v2  ;;  %703 = vmatpush.msrb.mxu3 %v442_v3  ;;  %v460_v3 = vld [vmem:[#allocation8 + $0x190] sm:$0xff] }
  0x53   :  { %166 = vmatmul.f32.gmra.mxu3 %v98_v24  ;;  %574 = vmatmul.f32.vlgmr.msrb.gmra.mxu0 %v1523_v58  ;;  %v473_v24 = vld [vmem:[#allocation8 + $0x1f8] sm:$0xff] }
  0x54   :  { %623 = vmatpush.msra.mxu0 %v441_v59  ;;  %821 = vmatpush.msrb.mxu1 %v486_v51  ;;  %v521_v51 = vld [vmem:[#allocation8 + $0x378] sm:$0xff] }
  0x55   :  { %948 = vmatpush.msra.mxu3 %v521_v51  ;;  %v511_v51 = vld [vmem:[#allocation8 + $0x328] sm:$0xff] }
  0x56   :  { %624 = vmatpush.msra.mxu0 %v440_v62  ;;  %822 = vmatpush.msrb.mxu1 %v485_v0 }
  0x58   :  { %625 = vmatpush.msra.mxu0 %v439_v1  ;;  %v461_v1 = vld [vmem:[#allocation8 + $0x198] sm:$0xff] }
  0x5a   :  { %626 = vmatpush.msra.mxu0 %v438_v4  ;;  %v484_v4 = vld [vmem:[#allocation8 + $0x250] sm:$0xff] }
  0x5b   :  { %169 = vmatmul.f32.gmra.mxu3 %v99_v25  ;;  %v472_v25 = vld [vmem:[#allocation8 + $0x1f0] sm:$0xff]  ;;  %823 = vmatpush.msrb.mxu1 %v484_v4  ;;  %v477_v4 = vld [vmem:[#allocation8 + $0x218] sm:$0xff] }
  0x5c   :  { %627 = vmatpush.msra.mxu0 %v437_v6  ;;  %v459_v6 = vld [vmem:[#allocation8 + $0x188] sm:$0xff] }
  0x5e   :  { %628 = vmatpush.msra.mxu0 %v436_v7  ;;  %v281_v7 = vld [vmem:[#allocation2 + $0x1] sm:$0xff] }
  0x60   :  { %629 = vmatpush.msra.mxu0 %v435_v8 }
  0x62   :  { %630 = vmatpush.msra.mxu0 %v434_v9 }
  0x63   :  { %172 = vmatmul.f32.gmra.mxu3 %v100_v34 }
  0x64   :  { %631 = vmatpush.msra.mxu0 %v433_v10  ;;  %v458_v10 = vld [vmem:[#allocation8 + $0x180] sm:$0xff] }
  0x66   :  { %632 = vmatpush.msra.mxu0 %v432_v11 }
  0x68   :  { %633 = vmatpush.msra.mxu0 %v431_v12  ;;  %v483_v12 = vld [vmem:[#allocation8 + $0x248] sm:$0xff] }
  0x69   :  { %824 = vmatpush.msrb.mxu1 %v483_v12  ;;  %v516_v12 = vld [vmem:[#allocation8 + $0x350] sm:$0xff] }
  0x6a   :  { %634 = vmatpush.msra.mxu0 %v430_v13 }
  0x6b   :  { %175 = vmatmul.f32.gmra.mxu3 %v101_v43 }
  0x6c   :  { %635 = vmatpush.msra.mxu0 %v429_v14 }
  0x6e   :  { %636 = vmatpush.msra.mxu0 %v428_v15 }
  0x70   :  { %637 = vmatpush.msra.mxu0 %v427_v16 }
  0x72   :  { %638 = vmatpush.msra.mxu0 %v426_v17 }
  0x73   :  { %178 = vmatmul.f32.gmra.mxu3 %v102_v52 }
  0x74   :  { %753 = vmatpush.msrb.mxu0 %v473_v24 }
  0x76   :  { %754 = vmatpush.msrb.mxu0 %v472_v25 }
  0x78   :  { %755 = vmatpush.msrb.mxu0 %v471_v29 }
  0x7a   :  { %756 = vmatpush.msrb.mxu0 %v470_v33 }
  0x7b   :  { %181 = vmatmul.f32.gmra.mxu3 %v103_v55 }
  0x7c   :  { %757 = vmatpush.msrb.mxu0 %v469_v37 }
  0x7e   :  { %758 = vmatpush.msrb.mxu0 %v468_v40 }
  0x80   :  { %759 = vmatpush.msrb.mxu0 %v467_v44  ;;  %v503_v44 = vld [vmem:[#allocation8 + $0x2e8] sm:$0xff] }
  0x82   :  { %760 = vmatpush.msrb.mxu0 %v466_v46  ;;  %v305_v46 = vld [vmem:[#allocation2 + $0xa2] sm:$0xff] }
  0x83   :  { %184 = vmatmul.f32.gmra.mxu3 %v104_v56 }
  0x84   :  { %761 = vmatpush.msrb.mxu0 %v465_v50 }
  0x86   :  { %762 = vmatpush.msrb.mxu0 %v464_v53  ;;  %v520_v53 = vld [vmem:[#allocation8 + $0x370] sm:$0xff] }
  0x87   :  { %949 = vmatpush.msra.mxu3 %v520_v53 }
  0x8b   :  { %187 = vmatmul.f32.gmra.mxu3 %v105_v57  ;;  %v463_v57 = vld [vmem:[#allocation8 + $0x1a8] sm:$0xff] }
  0x8c   :  { %763 = vmatpush.msrb.mxu0 %v463_v57  ;;  %v519_v57 = vld [vmem:[#allocation8 + $0x368] sm:$0xff] }
  0x8d   :  { %950 = vmatpush.msra.mxu3 %v519_v57  ;;  %v537_v57 = vld [vmem:[#allocation8 + $0x3f8] sm:$0xff] }
  0x8e   :  { %764 = vmatpush.msrb.mxu0 %v462_v60 }
  0x90   :  { %765 = vmatpush.msrb.mxu0 %v461_v1  ;;  %v518_v1 = vld [vmem:[#allocation8 + $0x360] sm:$0xff] }
  0x91   :  { %951 = vmatpush.msra.mxu3 %v518_v1  ;;  %v491_v1 = vld [vmem:[#allocation8 + $0x288] sm:$0xff] }
  0x92   :  { %766 = vmatpush.msrb.mxu0 %v460_v3 }
  0x93   :  { %704 = vmatmul.f32.vlgmr.msrb.gmra.mxu3 %v297_v5 }
  0x94   :  { %767 = vmatpush.msrb.mxu0 %v459_v6  ;;  %v517_v6 = vld [vmem:[#allocation8 + $0x358] sm:$0xff] }
  0x95   :  { %952 = vmatpush.msra.mxu3 %v517_v6  ;;  %v509_v6 = vld [vmem:[#allocation8 + $0x318] sm:$0xff] }
  0x96   :  { %768 = vmatpush.msrb.mxu0 %v458_v10  ;;  %v476_v10 = vld [vmem:[#allocation8 + $0x210] sm:$0xff] }
  0x97   :  { %953 = vmatpush.msra.mxu3 %v516_v12 }
  0xb0   :  { %v143_v19 = vpop.f32.mrf.mxu0 }
  0xb1   :  { %v144_v20 = vadd.f32 %v1625_v18, %v143_v19  ;;  %v482_v19 = vld [vmem:[#allocation8 + $0x240] sm:$0xff] }
  0xb2   :  { %825 = vmatpush.msrb.mxu1 %v482_v19 }
  0xb3   :  { %v1634_v21 = vmax.f32 %v144_v20, 0.0 }
  0xb5   :  { %249 = vst [vmem:[#allocation2 + $0x11] sm:$0xff] %v1634_v21 }
  0xb6   :  { %v155_v22 = vpop.f32.mrf.mxu3 }
  0xb7   :  { %v156_v26 = vadd.f32 %v1625_v18, %v155_v22 }
  0xb8   :  { %v146_v28 = vpop.f32.mrf.mxu0 }
  0xb9   :  { %v147_v30 = vadd.f32 %v1625_v18, %v146_v28  ;;  %v1641_v31 = vmax.f32 %v156_v26, 0.0  ;;  %v481_v26 = vld [vmem:[#allocation8 + $0x238] sm:$0xff] }
  0xba   :  { %826 = vmatpush.msrb.mxu1 %v481_v26  ;;  %v496_v26 = vld [vmem:[#allocation8 + $0x2b0] sm:$0xff] }
  0xbb   :  { %v1643_v32 = vmax.f32 %v147_v30, 0.0  ;;  %253 = vst [vmem:[#allocation2 + $0x51] sm:$0xff] %v1641_v31 }
  0xbc   :  { %v1646_v34 = vld [vmem:[#allocation2 + $0x10] sm:$0xff]  ;;  %827 = vmatpush.msrb.mxu1 %v480_v27 }
  0xbd   :  { %v1648_v35 = vld [vmem:[#allocation2 + $0x12] sm:$0xff]  ;;  %250 = vst [vmem:[#allocation2 + $0x21] sm:$0xff] %v1643_v32  ;;  %577 = vmatmul.f32.gmra.mxu0 %v1646_v34 }
  0xbe   :  { %707 = vmatmul.f32.gmra.mxu3 %v1648_v35  ;;  %v158_v36 = vpop.f32.mrf.mxu3  ;;  %828 = vmatpush.msrb.mxu1 %v479_v38 }
  0xbf   :  { %v159_v39 = vadd.f32 %v1625_v18, %v158_v36  ;;  %v289_v36 = vld [vmem:[#allocation2 + $0xa1] sm:$0xff] }
  0xc0   :  { %v149_v41 = vpop.f32.mrf.mxu0 }
  0xc1   :  { %v150_v42 = vadd.f32 %v1625_v18, %v149_v41  ;;  %v1655_v43 = vmax.f32 %v159_v39, 0.0  ;;  %v505_v39 = vld [vmem:[#allocation8 + $0x2f8] sm:$0xff]  ;;  %v504_v41 = vld [vmem:[#allocation8 + $0x2f0] sm:$0xff] }
  0xc2   :  { %v1696_v15 = vld [vmem:[#allocation2 + $0x50] sm:$0xff]  ;;  %883 = vmatpush.msrb.mxu2 %v505_v39  ;;  %v513_v39 = vld [vmem:[#allocation8 + $0x338] sm:$0xff] }
  0xc3   :  { %v1657_v45 = vmax.f32 %v150_v42, 0.0  ;;  %254 = vst [vmem:[#allocation2 + $0x61] sm:$0xff] %v1655_v43  ;;  %v1698_v16 = vld [vmem:[#allocation2 + $0x52] sm:$0xff] }
  0xc4   :  { %v1660_v47 = vld [vmem:[#allocation2 + $0x20] sm:$0xff]  ;;  %884 = vmatpush.msrb.mxu2 %v504_v41 }
  0xc5   :  { %v1662_v48 = vld [vmem:[#allocation2 + $0x22] sm:$0xff]  ;;  %251 = vst [vmem:[#allocation2 + $0x31] sm:$0xff] %v1657_v45  ;;  %580 = vmatmul.f32.gmra.mxu0 %v1660_v47 }
  0xc6   :  { %710 = vmatmul.f32.gmra.mxu3 %v1662_v48  ;;  %v161_v49 = vpop.f32.mrf.mxu3  ;;  %885 = vmatpush.msrb.mxu2 %v503_v44 }
  0xc7   :  { %v162_v52 = vadd.f32 %v1625_v18, %v161_v49  ;;  %v502_v49 = vld [vmem:[#allocation8 + $0x2e0] sm:$0xff] }
  0xc8   :  { %v152_v54 = vpop.f32.mrf.mxu0  ;;  %886 = vmatpush.msrb.mxu2 %v502_v49  ;;  %v512_v49 = vld [vmem:[#allocation8 + $0x330] sm:$0xff] }
  0xc9   :  { %v153_v55 = vadd.f32 %v1625_v18, %v152_v54  ;;  %v1669_v56 = vmax.f32 %v162_v52, 0.0  ;;  %v478_v52 = vld [vmem:[#allocation8 + $0x220] sm:$0xff] }
  0xca   :  { %v1708_v23 = vld [vmem:[#allocation2 + $0x60] sm:$0xff]  ;;  %829 = vmatpush.msrb.mxu1 %v478_v52 }
  0xcb   :  { %v1671_v59 = vmax.f32 %v153_v55, 0.0  ;;  %255 = vst [vmem:[#allocation2 + $0x71] sm:$0xff] %v1669_v56  ;;  %v1710_v24 = vld [vmem:[#allocation2 + $0x62] sm:$0xff]  ;;  %v501_v55 = vld [vmem:[#allocation8 + $0x2d8] sm:$0xff] }
  0xcc   :  { %v1674_v61 = vld [vmem:[#allocation2 + $0x30] sm:$0xff]  ;;  %887 = vmatpush.msrb.mxu2 %v501_v55  ;;  %830 = vmatpush.msrb.mxu1 %v477_v4  ;;  %v474_v52 = vld [vmem:[#allocation8 + $0x200] sm:$0xff] }
  0xcd   :  { %v1676_v62 = vld [vmem:[#allocation2 + $0x32] sm:$0xff]  ;;  %252 = vst [vmem:[#allocation2 + $0x41] sm:$0xff] %v1671_v59  ;;  %583 = vmatmul.f32.gmra.mxu0 %v1674_v61  ;;  %651 = vmatmul.f32.vlgmr.msra.gmra.mxu2 %v1671_v59 }
  0xce   :  { %713 = vmatmul.f32.gmra.mxu3 %v1676_v62  ;;  %v164_v63 = vpop.f32.mrf.mxu3  ;;  %831 = vmatpush.msrb.mxu1 %v476_v10  ;;  %v553_v10 = vld [vmem:[#allocation8 + $0x478] sm:$0xff] }
  0xcf   :  { %v165_v2 = vadd.f32 %v1625_v18, %v164_v63  ;;  %v500_v63 = vld [vmem:[#allocation8 + $0x2d0] sm:$0xff] }
  0xd0   :  { %888 = vmatpush.msrb.mxu2 %v500_v63  ;;  %v510_v63 = vld [vmem:[#allocation8 + $0x320] sm:$0xff] }
  0xd1   :  { %v1683_v5 = vmax.f32 %v165_v2, 0.0  ;;  %v499_v2 = vld [vmem:[#allocation8 + $0x2c8] sm:$0xff] }
  0xd2   :  { %v1720_v30 = vld [vmem:[#allocation2 + $0x70] sm:$0xff]  ;;  %889 = vmatpush.msrb.mxu2 %v499_v2 }
  0xd3   :  { %256 = vst [vmem:[#allocation2 + $0x81] sm:$0xff] %v1683_v5  ;;  %v1722_v33 = vld [vmem:[#allocation2 + $0x72] sm:$0xff] }
  0xd4   :  { %v1686_v8 = vld [vmem:[#allocation2 + $0x40] sm:$0xff] }
  0xd5   :  { %v1688_v9 = vld [vmem:[#allocation2 + $0x42] sm:$0xff]  ;;  %586 = vmatmul.f32.vlgmr.msra.gmra.mxu1 %v1686_v8  ;;  %639 = vmatmul.f32.vlgmr.msra.gmra.mxu0 %v281_v7 }
  0xd6   :  { %716 = vmatmul.f32.gmra.mxu3 %v1688_v9  ;;  %654 = vmatmul.f32.gmra.mxu2 %v1641_v31  ;;  %v167_v11 = vpop.f32.mrf.mxu3 }
  0xd7   :  { %v168_v13 = vadd.f32 %v1625_v18, %v167_v11  ;;  %v498_v11 = vld [vmem:[#allocation8 + $0x2c0] sm:$0xff]  ;;  %1013 = vmatpush.msra.mxu0 %v537_v57 }
  0xd8   :  { %890 = vmatpush.msrb.mxu2 %v498_v11  ;;  %v507_v11 = vld [vmem:[#allocation8 + $0x308] sm:$0xff] }
  0xd9   :  { %v1694_v14 = vmax.f32 %v168_v13, 0.0 }
  0xdb   :  { %257 = vst [vmem:[#allocation2 + $0xb1] sm:$0xff] %v1694_v14 }
  0xdd   :  { %589 = vmatmul.f32.gmra.mxu1 %v1696_v15  ;;  %642 = vmatmul.f32.gmra.mxu0 %v1634_v21 }
  0xde   :  { %719 = vmatmul.f32.gmra.mxu3 %v1698_v16  ;;  %657 = vmatmul.f32.gmra.mxu2 %v1655_v43  ;;  %v170_v17 = vpop.f32.mrf.mxu3 }
  0xdf   :  { %v171_v20 = vadd.f32 %v1625_v18, %v170_v17  ;;  %v497_v17 = vld [vmem:[#allocation8 + $0x2b8] sm:$0xff] }
  0xe0   :  { %891 = vmatpush.msrb.mxu2 %v497_v17 }
  0xe1   :  { %v1706_v22 = vmax.f32 %v171_v20, 0.0 }
  0xe2   :  { %v1740_v0 = vld [vmem:[#allocation2 + $0xb2] sm:$0xff]  ;;  %892 = vmatpush.msrb.mxu2 %v496_v26  ;;  %v506_v26 = vld [vmem:[#allocation8 + $0x300] sm:$0xff] }
  0xe3   :  { %258 = vst [vmem:[#allocation2 + $0xc1] sm:$0xff] %v1706_v22 }
  0xe5   :  { %592 = vmatmul.f32.gmra.mxu1 %v1708_v23  ;;  %645 = vmatmul.f32.gmra.mxu0 %v1643_v32 }
  0xe6   :  { %722 = vmatmul.f32.gmra.mxu3 %v1710_v24  ;;  %660 = vmatmul.f32.gmra.mxu2 %v1669_v56  ;;  %v173_v25 = vpop.f32.mrf.mxu3 }
  0xe7   :  { %v174_v28 = vadd.f32 %v1625_v18, %v173_v25  ;;  %v515_v25 = vld [vmem:[#allocation8 + $0x348] sm:$0xff] }
  0xe8   :  { %954 = vmatpush.msra.mxu3 %v515_v25  ;;  %v536_v25 = vld [vmem:[#allocation8 + $0x3f0] sm:$0xff] }
  0xe9   :  { %v1718_v29 = vmax.f32 %v174_v28, 0.0  ;;  %v514_v28 = vld [vmem:[#allocation8 + $0x340] sm:$0xff]  ;;  %1014 = vmatpush.msra.mxu0 %v536_v25 }
  0xea   :  { %v1750_v19 = vld [vmem:[#allocation2 + $0xc0] sm:$0xff]  ;;  %955 = vmatpush.msra.mxu3 %v514_v28 }
  0xeb   :  { %259 = vst [vmem:[#allocation2 + $0xd1] sm:$0xff] %v1718_v29  ;;  %v1752_v20 = vld [vmem:[#allocation2 + $0xc2] sm:$0xff] }
  0xec   :  { %956 = vmatpush.msra.mxu3 %v513_v39 }
  0xed   :  { %595 = vmatmul.f32.gmra.mxu1 %v1720_v30  ;;  %648 = vmatmul.f32.gmra.mxu0 %v1657_v45 }
  0xee   :  { %725 = vmatmul.f32.gmra.mxu3 %v1722_v33  ;;  %663 = vmatmul.f32.gmra.mxu2 %v289_v36  ;;  %v176_v37 = vpop.f32.mrf.mxu3  ;;  %v475_v36 = vld [vmem:[#allocation8 + $0x208] sm:$0xff] }
  0xef   :  { %v177_v40 = vadd.f32 %v1625_v18, %v176_v37  ;;  %v495_v37 = vld [vmem:[#allocation8 + $0x2a8] sm:$0xff]  ;;  %832 = vmatpush.msrb.mxu1 %v475_v36  ;;  %957 = vmatpush.msra.mxu3 %v512_v49  ;;  %v534_v49 = vld [vmem:[#allocation8 + $0x3e0] sm:$0xff] }
  0xf0   :  { %893 = vmatpush.msrb.mxu2 %v495_v37  ;;  %v535_v37 = vld [vmem:[#allocation8 + $0x3e8] sm:$0xff] }
  0xf1   :  { %v1729_v42 = vmax.f32 %v177_v40, 0.0  ;;  %v494_v40 = vld [vmem:[#allocation8 + $0x2a0] sm:$0xff]  ;;  %833 = vmatpush.msrb.mxu1 %v474_v52  ;;  %958 = vmatpush.msra.mxu3 %v511_v51  ;;  %v1809_v52 = vpop.f32.mrf.mxu0 }
  0xf2   :  { %v1762_v44 = vld [vmem:[#allocation2 + $0xd0] sm:$0xff]  ;;  %894 = vmatpush.msrb.mxu2 %v494_v40  ;;  %1015 = vmatpush.msra.mxu0 %v535_v37  ;;  %v550_v51 = vld [vmem:[#allocation8 + $0x460] sm:$0xff]  ;;  %v545_v37 = vld [vmem:[#allocation8 + $0x438] sm:$0xff] }
  0xf3   :  { %260 = vst [vmem:[#allocation2 + $0xe1] sm:$0xff] %v1729_v42  ;;  %959 = vmatpush.msra.mxu3 %v510_v63  ;;  %1078 = vmatpush.msra.mxu1 %v553_v10  ;;  %v530_v63 = vld [vmem:[#allocation8 + $0x3c0] sm:$0xff] }
  0xf4   :  { %1016 = vmatpush.msra.mxu0 %v534_v49  ;;  %v522_v49 = vld [vmem:[#allocation8 + $0x380] sm:$0xff] }
  0xf5   :  { %598 = vmatmul.f32.gmra.mxu1 %v1523_v58  ;;  %769 = vmatmul.f32.vlgmr.msrb.gmra.mxu0 %v1646_v34  ;;  %v1738_v34 = vld [vmem:[#allocation2 + $0xb0] sm:$0xff] }
  0xf6   :  { %728 = vmatmul.f32.gmra.mxu3 %v305_v46  ;;  %666 = vmatmul.f32.gmra.mxu2 %v1694_v14  ;;  %v179_v50 = vpop.f32.mrf.mxu3  ;;  %v1764_v46 = vld [vmem:[#allocation2 + $0xd2] sm:$0xff] }
  0xf7   :  { %v180_v54 = vadd.f32 %v1625_v18, %v179_v50  ;;  %v493_v50 = vld [vmem:[#allocation8 + $0x298] sm:$0xff]  ;;  %960 = vmatpush.msra.mxu3 %v509_v6 }
  0xf8   :  { %895 = vmatpush.msrb.mxu2 %v493_v50  ;;  %v1803_v50 = vld [vmem:[#allocation2 + $0x80] sm:$0xff] }
  0xf9   :  { %v1736_v60 = vmax.f32 %v180_v54, 0.0  ;;  %v492_v54 = vld [vmem:[#allocation8 + $0x290] sm:$0xff] }
  0xfa   :  { %896 = vmatpush.msrb.mxu2 %v492_v54  ;;  %v1776_v4 = vld [vmem:[#allocation2 + $0xe2] sm:$0xff] }
  0xfb   :  { %261 = vst [vmem:[#allocation2 + $0xf1] sm:$0xff] %v1736_v60 }
  0xfc   :  { %897 = vmatpush.msrb.mxu2 %v491_v1  ;;  %v528_v1 = vld [vmem:[#allocation8 + $0x3b0] sm:$0xff] }
  0xfd   :  { %601 = vmatmul.f32.gmra.mxu1 %v1738_v34  ;;  %772 = vmatmul.f32.gmra.mxu0 %v1660_v47 }
  0xfe   :  { %731 = vmatmul.f32.gmra.mxu3 %v1740_v0  ;;  %669 = vmatmul.f32.gmra.mxu2 %v1706_v22  ;;  %v182_v3 = vpop.f32.mrf.mxu3 }
  0xff   :  { %v183_v7 = vadd.f32 %v1625_v18, %v182_v3  ;;  %v1774_v3 = vld [vmem:[#allocation2 + $0xe0] sm:$0xff] }
 0x101   :  { %v1748_v13 = vmax.f32 %v183_v7, 0.0  ;;  %v490_v7 = vld [vmem:[#allocation8 + $0x280] sm:$0xff] }
 0x102   :  { %898 = vmatpush.msrb.mxu2 %v490_v7  ;;  %v1783_v12 = vld [vmem:[#allocation2 + $0xf0] sm:$0xff]  ;;  %v527_v7 = vld [vmem:[#allocation8 + $0x3a8] sm:$0xff] }
 0x103   :  { %262 = vst [vmem:[#allocation2 + $0x101] sm:$0xff] %v1748_v13  ;;  %v1785_v17 = vld [vmem:[#allocation2 + $0xf2] sm:$0xff] }
 0x105   :  { %604 = vmatmul.f32.gmra.mxu1 %v1750_v19  ;;  %775 = vmatmul.f32.gmra.mxu0 %v1674_v61 }
 0x106   :  { %734 = vmatmul.f32.gmra.mxu3 %v1752_v20  ;;  %672 = vmatmul.f32.gmra.mxu2 %v1718_v29  ;;  %v185_v27 = vpop.f32.mrf.mxu3 }
 0x107   :  { %v186_v38 = vadd.f32 %v1625_v18, %v185_v27  ;;  %v552_v27 = vld [vmem:[#allocation8 + $0x470] sm:$0xff] }
 0x108   :  { %1079 = vmatpush.msra.mxu1 %v552_v27  ;;  %v523_v27 = vld [vmem:[#allocation8 + $0x388] sm:$0xff] }
 0x109   :  { %v1760_v41 = vmax.f32 %v186_v38, 0.0  ;;  %v551_v38 = vld [vmem:[#allocation8 + $0x468] sm:$0xff] }
 0x10a   :  { %v1791_v28 = vld [vmem:[#allocation2 + $0x100] sm:$0xff]  ;;  %1080 = vmatpush.msra.mxu1 %v551_v38 }
 0x10b   :  { %263 = vst [vmem:[#allocation2 + $0x111] sm:$0xff] %v1760_v41  ;;  %v1793_v36 = vld [vmem:[#allocation2 + $0x102] sm:$0xff] }
 0x10c   :  { %1081 = vmatpush.msra.mxu1 %v550_v51 }
 0x10d   :  { %607 = vmatmul.f32.gmra.mxu1 %v1762_v44  ;;  %778 = vmatmul.f32.gmra.mxu0 %v1686_v8 }
 0x10e   :  { %737 = vmatmul.f32.gmra.mxu3 %v1764_v46  ;;  %675 = vmatmul.f32.gmra.mxu2 %v1729_v42  ;;  %v188_v53 = vpop.f32.mrf.mxu3 }
 0x10f   :  { %v189_v55 = vadd.f32 %v1625_v18, %v188_v53  ;;  %v508_v18 = vld [vmem:[#allocation8 + $0x310] sm:$0xff]  ;;  %v533_v53 = vld [vmem:[#allocation8 + $0x3d8] sm:$0xff] }
 0x110   :  { %961 = vmatpush.msra.mxu3 %v508_v18  ;;  %1017 = vmatpush.msra.mxu0 %v533_v53  ;;  %v525_v18 = vld [vmem:[#allocation8 + $0x398] sm:$0xff] }
 0x111   :  { %v1772_v2 = vmax.f32 %v189_v55, 0.0  ;;  %v549_v55 = vld [vmem:[#allocation8 + $0x458] sm:$0xff] }
 0x112   :  { %962 = vmatpush.msra.mxu3 %v507_v11  ;;  %v1799_v39 = vld [vmem:[#allocation2 + $0x110] sm:$0xff]  ;;  %1082 = vmatpush.msra.mxu1 %v549_v55  ;;  %v1844_v11 = vld [vmem:[%s2098_s4] ss:$0 sm:$0xff] }
 0x113   :  { %264 = vst [vmem:[#allocation2 + $0x121] sm:$0xff] %v1772_v2  ;;  %v1801_v40 = vld [vmem:[#allocation2 + $0x112] sm:$0xff] }
 0x114   :  { %963 = vmatpush.msra.mxu3 %v506_v26 }
 0x115   :  { %610 = vmatmul.f32.gmra.mxu1 %v1774_v3  ;;  %781 = vmatmul.f32.gmra.mxu0 %v1696_v15 }
 0x116   :  { %740 = vmatmul.f32.gmra.mxu3 %v1776_v4  ;;  %678 = vmatmul.f32.gmra.mxu2 %v1736_v60  ;;  %v1814_v54 = vpop.f32.mrf.mxu3 }
 0x11d   :  { %613 = vmatmul.f32.gmra.mxu1 %v1783_v12  ;;  %784 = vmatmul.f32.gmra.mxu0 %v1708_v23 }
 0x11e   :  { %743 = vmatmul.f32.gmra.mxu3 %v1785_v17  ;;  %681 = vmatmul.f32.gmra.mxu2 %v1748_v13 }
 0x125   :  { %616 = vmatmul.f32.gmra.mxu1 %v1791_v28  ;;  %787 = vmatmul.f32.gmra.mxu0 %v1720_v30 }
 0x126   :  { %746 = vmatmul.f32.gmra.mxu3 %v1793_v36  ;;  %684 = vmatmul.f32.gmra.mxu2 %v1760_v41 }
 0x12d   :  { %619 = vmatmul.f32.gmra.mxu1 %v1799_v39  ;;  %790 = vmatmul.f32.gmra.mxu0 %v1803_v50 }
 0x12e   :  { %749 = vmatmul.f32.gmra.mxu3 %v1801_v40  ;;  %899 = vmatmul.f32.vlgmr.msrb.gmra.mxu2 %v1648_v35  ;;  %v532_v35 = vld [vmem:[#allocation8 + $0x3d0] sm:$0xff] }
 0x12f   :  { %1018 = vmatpush.msra.mxu0 %v532_v35 }
 0x135   :  { %793 = vmatmul.f32.gmra.mxu0 %v1738_v34  ;;  %834 = vmatmul.f32.vlgmr.msrb.gmra.mxu1 %v1634_v21  ;;  %v548_v21 = vld [vmem:[#allocation8 + $0x450] sm:$0xff] }
 0x136   :  { %964 = vmatmul.f32.vlgmr.msra.gmra.mxu3 %v1660_v47  ;;  %902 = vmatmul.f32.gmra.mxu2 %v1662_v48  ;;  %v531_v48 = vld [vmem:[#allocation8 + $0x3c8] sm:$0xff] }
 0x137   :  { %1083 = vmatpush.msra.mxu1 %v548_v21  ;;  %1019 = vmatpush.msra.mxu0 %v531_v48 }
 0x139   :  { %1020 = vmatpush.msra.mxu0 %v530_v63 }
 0x13a   :  { %v1817_v57 = vpop.f32.mrf.mxu0 }
 0x13d   :  { %796 = vmatmul.f32.gmra.mxu0 %v1750_v19  ;;  %837 = vmatmul.f32.gmra.mxu1 %v1643_v32  ;;  %v547_v32 = vld [vmem:[#allocation8 + $0x448] sm:$0xff] }
 0x13e   :  { %967 = vmatmul.f32.gmra.mxu3 %v1674_v61  ;;  %905 = vmatmul.f32.gmra.mxu2 %v1676_v62  ;;  %v529_v61 = vld [vmem:[#allocation8 + $0x3b8] sm:$0xff] }
 0x13f   :  { %1084 = vmatpush.msra.mxu1 %v547_v32  ;;  %1021 = vmatpush.msra.mxu0 %v529_v61 }
 0x141   :  { %v1823_v47 = vpop.f32.mrf.mxu3  ;;  %1022 = vmatpush.msra.mxu0 %v528_v1 }
 0x142   :  { %v1825_v34 = vpop.f32.mrf.mxu0 }
 0x143   :  { %1023 = vmatpush.msra.mxu0 %v527_v7 }
 0x145   :  { %799 = vmatmul.f32.gmra.mxu0 %v1762_v44  ;;  %840 = vmatmul.f32.gmra.mxu1 %v1657_v45  ;;  %v526_v45 = vld [vmem:[#allocation8 + $0x3a0] sm:$0xff] }
 0x146   :  { %970 = vmatmul.f32.gmra.mxu3 %v1686_v8  ;;  %908 = vmatmul.f32.gmra.mxu2 %v1688_v9  ;;  %v546_v8 = vld [vmem:[#allocation8 + $0x440] sm:$0xff] }
 0x147   :  { %1085 = vmatpush.msra.mxu1 %v546_v8  ;;  %1024 = vmatpush.msra.mxu0 %v526_v45  ;;  %v1869_v8 = vld [vmem:[#allocation2 + $0x82] sm:$0xff] }
 0x149   :  { %v1831_v62 = vpop.f32.mrf.mxu3  ;;  %1025 = vmatpush.msra.mxu0 %v525_v18  ;;  %1086 = vmatpush.msra.mxu1 %v545_v37 }
 0x14a   :  { %v1833_v6 = vpop.f32.mrf.mxu0 }
 0x14d   :  { %802 = vmatmul.f32.gmra.mxu0 %v1774_v3  ;;  %843 = vmatmul.f32.gmra.mxu1 %v1671_v59 }
 0x14e   :  { %973 = vmatmul.f32.gmra.mxu3 %v1696_v15  ;;  %911 = vmatmul.f32.gmra.mxu2 %v1698_v16  ;;  %v524_v16 = vld [vmem:[#allocation8 + $0x390] sm:$0xff] }
 0x14f   :  { %1026 = vmatpush.msra.mxu0 %v524_v16  ;;  %v1877_v16 = vld [vmem:[#allocation2 + $0x120] sm:$0xff] }
 0x150   :  { %v652_v10 = vpop.f32.mrf.mxu2 }
 0x151   :  { %v1839_v9 = vpop.f32.mrf.mxu3  ;;  %1027 = vmatpush.msra.mxu0 %v523_v27 }
 0x152   :  { %v587_v25 = vpop.f32.mrf.mxu1  ;;  %v1846_v26 = vpop.f32.mrf.mxu0 }
 0x153   :  { %v588_v15 = vadd.f32 %v1844_v11, %v587_v25  ;;  %1028 = vmatpush.msra.mxu0 %v522_v49 }
 0x155   :  { %805 = vmatmul.f32.gmra.mxu0 %v1783_v12  ;;  %846 = vmatmul.f32.gmra.mxu1 %v1641_v31  ;;  %v653_v38 = vadd.f32 %v652_v10, %v588_v15 }
 0x156   :  { %976 = vmatmul.f32.gmra.mxu3 %v1708_v23  ;;  %914 = vmatmul.f32.gmra.mxu2 %v1710_v24  ;;  %v544_v23 = vld [vmem:[#allocation8 + $0x430] sm:$0xff] }
 0x157   :  { %1087 = vmatpush.msra.mxu1 %v544_v23 }
 0x159   :  { %v717_v51 = vpop.f32.mrf.mxu3  ;;  %v655_v21 = vpop.f32.mrf.mxu2 }
 0x15a   :  { %v1853_v53 = vadd.f32 %v717_v51, %v653_v38  ;;  %v590_v55 = vpop.f32.mrf.mxu1  ;;  %v1855_v35 = vpop.f32.mrf.mxu0 }
 0x15b   :  { %v591_v48 = vadd.f32 %v1844_v11, %v590_v55 }
 0x15d   :  { %808 = vmatmul.f32.gmra.mxu0 %v1791_v28  ;;  %849 = vmatmul.f32.gmra.mxu1 %v1655_v43  ;;  %v656_v24 = vadd.f32 %v655_v21, %v591_v48  ;;  %v378_v48 = vld [vmem:[#allocation2 + $0x21] sm:$0xff] }
 0x15e   :  { %979 = vmatmul.f32.gmra.mxu3 %v1720_v30  ;;  %917 = vmatmul.f32.gmra.mxu2 %v1722_v33  ;;  %v543_v30 = vld [vmem:[#allocation8 + $0x428] sm:$0xff] }
 0x15f   :  { %1088 = vmatpush.msra.mxu1 %v543_v30  ;;  %v1172_v30 = vld [vmem:[#allocation9 + $0x68] sm:$0xff] }
 0x161   :  { %v720_v63 = vpop.f32.mrf.mxu3  ;;  %v658_v45 = vpop.f32.mrf.mxu2 }
 0x162   :  { %v1862_v32 = vadd.f32 %v720_v63, %v656_v24  ;;  %v593_v61 = vpop.f32.mrf.mxu1  ;;  %v1864_v1 = vpop.f32.mrf.mxu0  ;;  %v379_v24 = vld [vmem:[#allocation2 + $0x31] sm:$0xff] }
 0x163   :  { %v594_v7 = vadd.f32 %v1844_v11, %v593_v61 }
 0x165   :  { %811 = vmatmul.f32.gmra.mxu0 %v1799_v39  ;;  %852 = vmatmul.f32.gmra.mxu1 %v1669_v56  ;;  %v659_v33 = vadd.f32 %v658_v45, %v594_v7  ;;  %v1936_v45 = vld [vmem:[#allocation2 + $0x122] sm:$0xff] }
 0x166   :  { %982 = vmatmul.f32.gmra.mxu3 %v1803_v50  ;;  %920 = vmatmul.f32.gmra.mxu2 %v1869_v8  ;;  %v542_v50 = vld [vmem:[#allocation8 + $0x420] sm:$0xff] }
 0x167   :  { %1089 = vmatpush.msra.mxu1 %v542_v50  ;;  %v1372_v50 = vld [vmem:[#allocation2] sm:$0xff] }
 0x169   :  { %v723_v18 = vpop.f32.mrf.mxu3  ;;  %v661_v37 = vpop.f32.mrf.mxu2 }
 0x16a   :  { %v1873_v10 = vadd.f32 %v723_v18, %v659_v33  ;;  %v596_v25 = vpop.f32.mrf.mxu1  ;;  %v1875_v15 = vpop.f32.mrf.mxu0 }
 0x16b   :  { %v597_v27 = vadd.f32 %v1844_v11, %v596_v25  ;;  %v385_v25 = vld [vmem:[#allocation2 + $0x91] sm:$0xff] }
 0x16d   :  { %814 = vmatmul.f32.gmra.mxu0 %v1877_v16  ;;  %855 = vmatmul.f32.gmra.mxu1 %v1683_v5  ;;  %v662_v38 = vadd.f32 %v661_v37, %v597_v27 }
 0x16e   :  { %985 = vmatmul.f32.gmra.mxu3 %v1523_v58  ;;  %923 = vmatmul.f32.gmra.mxu2 %v1740_v0  ;;  %v541_v58 = vld [vmem:[#allocation8 + $0x418] sm:$0xff] }
 0x16f   :  { %1090 = vmatpush.msra.mxu1 %v541_v58 }
 0x171   :  { %v726_v49 = vpop.f32.mrf.mxu3 }
 0x172   :  { %v1884_v51 = vadd.f32 %v726_v49, %v662_v38  ;;  %v1886_v55 = vpop.f32.mrf.mxu1  ;;  %v1888_v21 = vpop.f32.mrf.mxu0 }
 0x173   :  { %v600_v27 = vadd.f32 %v1844_v11, %v1886_v55  ;;  %v394_v55 = vld [vmem:[#allocation2 + $0x22] sm:$0xff] }
 0x175   :  { %858 = vmatmul.f32.gmra.mxu1 %v1694_v14  ;;  %1029 = vmatmul.f32.vlgmr.msra.gmra.mxu0 %v378_v48  ;;  %v540_v14 = vld [vmem:[#allocation8 + $0x410] sm:$0xff] }
 0x176   :  { %988 = vmatmul.f32.gmra.mxu3 %v1750_v19  ;;  %926 = vmatmul.f32.gmra.mxu2 %v1752_v20  ;;  %v539_v20 = vld [vmem:[#allocation8 + $0x408] sm:$0xff] }
 0x177   :  { %1091 = vmatpush.msra.mxu1 %v540_v14 }
 0x179   :  { %1092 = vmatpush.msra.mxu1 %v539_v20  ;;  %v729_v7 = vpop.f32.mrf.mxu3  ;;  %v1170_v20 = vld [vmem:[#allocation9 + $0x58] sm:$0xff] }
 0x17a   :  { %v1893_v0 = vpop.f32.mrf.mxu1  ;;  %v1895_v23 = vpop.f32.mrf.mxu0 }
 0x17b   :  { %v603_v48 = vadd.f32 %v1844_v11, %v1893_v0  ;;  %v395_v0 = vld [vmem:[#allocation2 + $0x32] sm:$0xff] }
 0x17d   :  { %861 = vmatmul.f32.gmra.mxu1 %v1706_v22  ;;  %1032 = vmatmul.f32.gmra.mxu0 %v379_v24 }
 0x17e   :  { %991 = vmatmul.f32.gmra.mxu3 %v1762_v44  ;;  %929 = vmatmul.f32.gmra.mxu2 %v1764_v46  ;;  %v538_v46 = vld [vmem:[#allocation8 + $0x400] sm:$0xff] }
 0x17f   :  { %1093 = vmatpush.msra.mxu1 %v538_v46 }
 0x182   :  { %v1900_v63 = vpop.f32.mrf.mxu1  ;;  %v1902_v19 = vpop.f32.mrf.mxu0 }
 0x185   :  { %864 = vmatmul.f32.gmra.mxu1 %v1718_v29  ;;  %1035 = vmatmul.f32.gmra.mxu0 %v1671_v59 }
 0x186   :  { %994 = vmatmul.f32.gmra.mxu3 %v1774_v3  ;;  %932 = vmatmul.f32.gmra.mxu2 %v1776_v4  ;;  %v1174_v4 = vld [vmem:[#allocation9 + $0x78] sm:$0xff] }
 0x187   :  { %1179 = vmatpush.msra.mxu2 %v1174_v4 }
 0x18a   :  { %v1908_v61 = vpop.f32.mrf.mxu1  ;;  %v1910_v44 = vpop.f32.mrf.mxu0 }
 0x18d   :  { %867 = vmatmul.f32.gmra.mxu1 %v1729_v42  ;;  %1038 = vmatmul.f32.gmra.mxu0 %v1641_v31 }
 0x18e   :  { %997 = vmatmul.f32.gmra.mxu3 %v1783_v12  ;;  %935 = vmatmul.f32.gmra.mxu2 %v1785_v17  ;;  %v1173_v17 = vld [vmem:[#allocation9 + $0x70] sm:$0xff] }
 0x18f   :  { %1180 = vmatpush.msra.mxu2 %v1173_v17 }
 0x191   :  { %1181 = vmatpush.msra.mxu2 %v1172_v30 }
 0x192   :  { %v1916_v59 = vpop.f32.mrf.mxu1  ;;  %v1918_v3 = vpop.f32.mrf.mxu0 }
 0x195   :  { %870 = vmatmul.f32.gmra.mxu1 %v1736_v60  ;;  %1041 = vmatmul.f32.gmra.mxu0 %v1655_v43  ;;  %v664_v43 = vpop.f32.mrf.mxu2 }
 0x196   :  { %1000 = vmatmul.f32.gmra.mxu3 %v1791_v28  ;;  %938 = vmatmul.f32.gmra.mxu2 %v1793_v36 }
 0x19a   :  { %v1924_v31 = vpop.f32.mrf.mxu1  ;;  %v1926_v12 = vpop.f32.mrf.mxu0 }
 0x19d   :  { %873 = vmatmul.f32.gmra.mxu1 %v1748_v13  ;;  %1044 = vmatmul.f32.gmra.mxu0 %v1669_v56  ;;  %v667_v56 = vpop.f32.mrf.mxu2 }
 0x19e   :  { %1003 = vmatmul.f32.gmra.mxu3 %v1799_v39  ;;  %941 = vmatmul.f32.gmra.mxu2 %v1801_v40  ;;  %v732_v39 = vpop.f32.mrf.mxu3  ;;  %v668_v46 = vadd.f32 %v667_v56, %v603_v48 }
 0x1a0   :  { %v733_v4 = vadd.f32 %v732_v39, %v668_v46  ;;  %v612_v46 = vadd.f32 %v1844_v11, %v1916_v59  ;;  %v398_v59 = vld [vmem:[#allocation2 + $0x62] sm:$0xff] }
 0x1a2   :  { %v1932_v28 = vpop.f32.mrf.mxu1  ;;  %v1934_v36 = vpop.f32.mrf.mxu0 }
 0x1a5   :  { %876 = vmatmul.f32.gmra.mxu1 %v1760_v41  ;;  %1047 = vmatmul.f32.gmra.mxu0 %v1683_v5  ;;  %v1171_v5 = vld [vmem:[#allocation9 + $0x60] sm:$0xff]  ;;  %v670_v58 = vpop.f32.mrf.mxu2 }
 0x1a6   :  { %1006 = vmatmul.f32.gmra.mxu3 %v1877_v16  ;;  %944 = vmatmul.f32.gmra.mxu2 %v1936_v45  ;;  %v665_v16 = vadd.f32 %v664_v43, %v600_v27  ;;  %v735_v24 = vpop.f32.mrf.mxu3 }
 0x1a7   :  { %1182 = vmatpush.msra.mxu2 %v1171_v5 }
 0x1a8   :  { %v730_v37 = vadd.f32 %v729_v7, %v665_v16  ;;  %v606_v7 = vadd.f32 %v1844_v11, %v1900_v63  ;;  %v609_v16 = vadd.f32 %v1844_v11, %v1908_v61  ;;  %v396_v63 = vld [vmem:[#allocation2 + $0x42] sm:$0xff]  ;;  %v397_v61 = vld [vmem:[#allocation2 + $0x52] sm:$0xff] }
 0x1a9   :  { %1183 = vmatpush.msra.mxu2 %v1170_v20 }
 0x1aa   :  { %v1942_v33 = vpop.f32.mrf.mxu1  ;;  %v1944_v18 = vpop.f32.mrf.mxu0  ;;  %v671_v5 = vadd.f32 %v670_v58, %v606_v7 }
 0x1ad   :  { %879 = vmatmul.f32.gmra.mxu1 %v1772_v2  ;;  %1050 = vmatmul.f32.gmra.mxu0 %v385_v25  ;;  %v673_v25 = vpop.f32.mrf.mxu2 }
 0x1ae   :  { %1009 = vmatmul.f32.gmra.mxu3 %v1372_v50  ;;  %v738_v27 = vpop.f32.mrf.mxu3  ;;  %v736_v50 = vadd.f32 %v735_v24, %v671_v5  ;;  %v615_v5 = vadd.f32 %v1844_v11, %v1924_v31 }
 0x1b2   :  { %v794_v38 = vpop.f32.mrf.mxu0  ;;  %v1949_v49 = vpop.f32.mrf.mxu1 }
 0x1b3   :  { %v1953_v14 = vadd.f32 %v794_v38, %v730_v37  ;;  %v1168_v38 = vld [vmem:[#allocation9 + $0x48] sm:$0xff] }
 0x1b5   :  { %1053 = vmatmul.f32.gmra.mxu0 %v1706_v22  ;;  %1094 = vmatmul.f32.vlgmr.msra.gmra.mxu1 %v394_v55  ;;  %v1169_v22 = vld [vmem:[#allocation9 + $0x50] sm:$0xff]  ;;  %v676_v48 = vpop.f32.mrf.mxu2 }
 0x1b6   :  { %1184 = vmatpush.msra.mxu2 %v1169_v22  ;;  %v741_v55 = vpop.f32.mrf.mxu3 }
 0x1b8   :  { %1185 = vmatpush.msra.mxu2 %v1168_v38 }
 0x1ba   :  { %v797_v17 = vpop.f32.mrf.mxu0  ;;  %v1956_v43 = vpop.f32.mrf.mxu1 }
 0x1bb   :  { %v1960_v30 = vadd.f32 %v797_v17, %v733_v4  ;;  %v677_v17 = vadd.f32 %v676_v48, %v612_v46 }
 0x1bd   :  { %1056 = vmatmul.f32.gmra.mxu0 %v1718_v29  ;;  %1097 = vmatmul.f32.gmra.mxu1 %v395_v0  ;;  %v674_v29 = vadd.f32 %v673_v25, %v609_v16  ;;  %v742_v7 = vadd.f32 %v741_v55, %v677_v17  ;;  %v679_v0 = vpop.f32.mrf.mxu2  ;;  %v621_v17 = vadd.f32 %v1844_v11, %v1942_v33  ;;  %v1163_v33 = vld [vmem:[#allocation9 + $0x20] sm:$0xff] }
 0x1be   :  { %v744_v25 = vpop.f32.mrf.mxu3 }
 0x1bf   :  { %v739_v20 = vadd.f32 %v738_v27, %v674_v29  ;;  %v618_v29 = vadd.f32 %v1844_v11, %v1932_v28  ;;  %v1164_v28 = vld [vmem:[#allocation9 + $0x28] sm:$0xff] }
 0x1c2   :  { %v800_v56 = vpop.f32.mrf.mxu0  ;;  %v1963_v39 = vpop.f32.mrf.mxu1 }
 0x1c3   :  { %v1967_v37 = vadd.f32 %v800_v56, %v736_v50  ;;  %v680_v56 = vadd.f32 %v679_v0, %v615_v5 }
 0x1c5   :  { %1059 = vmatmul.f32.gmra.mxu0 %v1729_v42  ;;  %1100 = vmatmul.f32.gmra.mxu1 %v396_v63  ;;  %v1167_v42 = vld [vmem:[#allocation9 + $0x40] sm:$0xff]  ;;  %v745_v16 = vadd.f32 %v744_v25, %v680_v56  ;;  %v682_v55 = vpop.f32.mrf.mxu2  ;;  %v401_v56 = vld [vmem:[#allocation2 + $0x92] sm:$0xff] }
 0x1c6   :  { %1186 = vmatpush.msra.mxu2 %v1167_v42  ;;  %v747_v31 = vpop.f32.mrf.mxu3 }
 0x1ca   :  { %v803_v58 = vpop.f32.mrf.mxu0  ;;  %v1970_v24 = vpop.f32.mrf.mxu1 }
 0x1cb   :  { %v1974_v4 = vadd.f32 %v803_v58, %v739_v20  ;;  %v399_v20 = vld [vmem:[#allocation2 + $0x72] sm:$0xff]  ;;  %v683_v58 = vadd.f32 %v682_v55, %v618_v29 }
 0x1cc   :  { %v1162_v29 = vld [vmem:[#allocation9 + $0x18] sm:$0xff] }
 0x1cd   :  { %1062 = vmatmul.f32.gmra.mxu0 %v1736_v60  ;;  %1103 = vmatmul.f32.gmra.mxu1 %v397_v61  ;;  %v1166_v60 = vld [vmem:[#allocation9 + $0x38] sm:$0xff]  ;;  %v748_v46 = vadd.f32 %v747_v31, %v683_v58  ;;  %v685_v0 = vpop.f32.mrf.mxu2 }
 0x1ce   :  { %1187 = vmatpush.msra.mxu2 %v1166_v60  ;;  %v750_v25 = vpop.f32.mrf.mxu3  ;;  %v393_v60 = vld [vmem:[#allocation2 + $0x131] sm:$0xff] }
 0x1d2   :  { %v806_v22 = vpop.f32.mrf.mxu0  ;;  %v1977_v27 = vpop.f32.mrf.mxu1 }
 0x1d3   :  { %v1981_v50 = vadd.f32 %v806_v22, %v742_v7 }
 0x1d5   :  { %1065 = vmatmul.f32.gmra.mxu0 %v1748_v13  ;;  %1106 = vmatmul.f32.gmra.mxu1 %v398_v59  ;;  %v1165_v13 = vld [vmem:[#allocation9 + $0x30] sm:$0xff] }
 0x1d6   :  { %1188 = vmatpush.msra.mxu2 %v1165_v13  ;;  %v1161_v13 = vld [vmem:[#allocation9 + $0x10] sm:$0xff] }
 0x1d8   :  { %1189 = vmatpush.msra.mxu2 %v1164_v28 }
 0x1da   :  { %v809_v63 = vpop.f32.mrf.mxu0  ;;  %v1984_v38 = vpop.f32.mrf.mxu1  ;;  %1190 = vmatpush.msra.mxu2 %v1163_v33 }
 0x1db   :  { %v1988_v48 = vadd.f32 %v809_v63, %v745_v16 }
 0x1dc   :  { %1191 = vmatpush.msra.mxu2 %v1162_v29 }
 0x1dd   :  { %1068 = vmatmul.f32.gmra.mxu0 %v1760_v41  ;;  %1109 = vmatmul.f32.gmra.mxu1 %v399_v20  ;;  %v686_v41 = vadd.f32 %v685_v0, %v621_v17  ;;  %v403_v20 = vld [vmem:[#allocation2 + $0xd2] sm:$0xff] }
 0x1de   :  { %1192 = vmatpush.msra.mxu2 %v1161_v13  ;;  %v405_v0 = vld [vmem:[#allocation2 + $0xf2] sm:$0xff] }
 0x1df   :  { %v751_v22 = vadd.f32 %v750_v25, %v686_v41  ;;  %v900_v25 = vpop.f32.mrf.mxu2  ;;  %v965_v41 = vpop.f32.mrf.mxu3 }
 0x1e2   :  { %v812_v61 = vpop.f32.mrf.mxu0  ;;  %v1991_v42 = vpop.f32.mrf.mxu1 }
 0x1e3   :  { %v813_v7 = vadd.f32 %v812_v61, %v748_v46  ;;  %v404_v61 = vld [vmem:[#allocation2 + $0xe2] sm:$0xff] }
 0x1e5   :  { %1071 = vmatmul.f32.gmra.mxu0 %v1772_v2  ;;  %1112 = vmatmul.f32.gmra.mxu1 %v1869_v8  ;;  %v402_v8 = vld [vmem:[#allocation2 + $0xc2] sm:$0xff] }
 0x1e7   :  { %v968_v33 = vpop.f32.mrf.mxu3 }
 0x1ea   :  { %v815_v5 = vpop.f32.mrf.mxu0  ;;  %v1997_v59 = vpop.f32.mrf.mxu1 }
 0x1eb   :  { %v816_v16 = vadd.f32 %v815_v5, %v751_v22 }
 0x1ed   :  { %1074 = vmatmul.f32.gmra.mxu0 %v393_v60  ;;  %1115 = vmatmul.f32.gmra.mxu1 %v401_v56  ;;  %v903_v56 = vpop.f32.mrf.mxu2 }
 0x1ef   :  { %v971_v13 = vpop.f32.mrf.mxu3 }
 0x1f2   :  { %v859_v63 = vpop.f32.mrf.mxu1  ;;  %v1030_v22 = vpop.f32.mrf.mxu0 }
 0x1f3   :  { %v2000_v2 = vadd.f32 %v859_v63, %v1953_v14  ;;  %v1160_v14 = vld [vmem:[#allocation9 + $0x8] sm:$0xff] }
 0x1f4   :  { %1193 = vmatpush.msra.mxu2 %v1160_v14 }
 0x1f5   :  { %1118 = vmatmul.f32.gmra.mxu1 %v402_v8 }
 0x1fa   :  { %v862_v55 = vpop.f32.mrf.mxu1  ;;  %v1033_v63 = vpop.f32.mrf.mxu0 }
 0x1fb   :  { %v2003_v31 = vadd.f32 %v862_v55, %v1960_v30  ;;  %v1159_v30 = vld [vmem:[#allocation9] sm:$0xff] }
 0x1fc   :  { %1194 = vmatpush.msra.mxu2 %v1159_v30 }
 0x1fd   :  { %1121 = vmatmul.f32.gmra.mxu1 %v403_v20  ;;  %v906_v20 = vpop.f32.mrf.mxu2 }
 0x202   :  { %v865_v58 = vpop.f32.mrf.mxu1  ;;  %v1036_v14 = vpop.f32.mrf.mxu0 }
 0x203   :  { %v2006_v46 = vadd.f32 %v865_v58, %v1967_v37  ;;  %v406_v37 = vld [vmem:[#allocation2 + $0x102] sm:$0xff] }
 0x205   :  { %1124 = vmatmul.f32.gmra.mxu1 %v404_v61  ;;  %v909_v30 = vpop.f32.mrf.mxu2 }
 0x20a   :  { %v868_v17 = vpop.f32.mrf.mxu1 }
 0x20b   :  { %v2009_v28 = vadd.f32 %v868_v17, %v1974_v4  ;;  %v576_v4 = vadd.f32 %v1844_v11, %v1809_v52  ;;  %v579_v52 = vadd.f32 %v1844_v11, %v1817_v57  ;;  %v582_v57 = vadd.f32 %v1844_v11, %v1825_v34 }
 0x20d   :  { %1127 = vmatmul.f32.gmra.mxu1 %v405_v0  ;;  %v641_v55 = vadd.f32 %v1846_v26, %v576_v4  ;;  %v644_v17 = vadd.f32 %v1855_v35, %v579_v52  ;;  %v409_v0 = vld [vmem:[#allocation2 + $0x132] sm:$0xff]  ;;  %v647_v35 = vadd.f32 %v1864_v1, %v582_v57 }
 0x20f   :  { %v706_v58 = vadd.f32 %v1814_v54, %v641_v55  ;;  %v974_v54 = vpop.f32.mrf.mxu3 }
 0x212   :  { %v871_v5 = vpop.f32.mrf.mxu1 }
 0x213   :  { %v2012_v60 = vadd.f32 %v871_v5, %v1981_v50 }
 0x215   :  { %1130 = vmatmul.f32.gmra.mxu1 %v406_v37 }
 0x217   :  { %v977_v52 = vpop.f32.mrf.mxu3 }
 0x21a   :  { %v874_v8 = vpop.f32.mrf.mxu1 }
 0x21b   :  { %v2017_v29 = vadd.f32 %v874_v8, %v1988_v48  ;;  %v771_v48 = vadd.f32 %v1888_v21, %v706_v58 }
 0x21d   :  { %1133 = vmatmul.f32.gmra.mxu1 %v1801_v40  ;;  %v836_v40 = vadd.f32 %v1949_v49, %v771_v48  ;;  %v585_v48 = vadd.f32 %v1844_v11, %v1833_v6 }
 0x21f   :  { %v901_v37 = vadd.f32 %v900_v25, %v836_v40  ;;  %v650_v1 = vadd.f32 %v1875_v15, %v585_v48  ;;  %v980_v11 = vpop.f32.mrf.mxu3  ;;  %v789_v48 = vadd.f32 %v1934_v36, %v1873_v10 }
 0x221   :  { %v966_v8 = vadd.f32 %v965_v41, %v901_v37 }
 0x222   :  { %v877_v50 = vpop.f32.mrf.mxu1 }
 0x223   :  { %v2022_v61 = vadd.f32 %v877_v50, %v813_v7  ;;  %v709_v7 = vadd.f32 %v1823_v47, %v644_v17  ;;  %v1031_v4 = vadd.f32 %v1030_v22, %v966_v8  ;;  %v712_v50 = vadd.f32 %v1831_v62, %v647_v35  ;;  %v912_v47 = vpop.f32.mrf.mxu2 }
 0x224   :  { %v715_v62 = vadd.f32 %v1839_v9, %v650_v1 }
 0x225   :  { %1136 = vmatmul.f32.gmra.mxu1 %v1936_v45  ;;  %v1039_v45 = vpop.f32.mrf.mxu0  ;;  %v774_v21 = vadd.f32 %v1895_v23, %v709_v7  ;;  %v777_v34 = vadd.f32 %v1902_v19, %v712_v50 }
 0x227   :  { %v839_v49 = vadd.f32 %v1956_v43, %v774_v21  ;;  %v842_v43 = vadd.f32 %v1963_v39, %v777_v34  ;;  %v783_v21 = vadd.f32 %v1918_v3, %v1853_v53  ;;  %v983_v8 = vpop.f32.mrf.mxu3  ;;  %v854_v34 = vadd.f32 %v1991_v42, %v789_v48 }
 0x229   :  { %v904_v58 = vadd.f32 %v903_v56, %v839_v49  ;;  %v907_v56 = vadd.f32 %v906_v20, %v842_v43  ;;  %v848_v20 = vadd.f32 %v1977_v27, %v783_v21  ;;  %v792_v43 = vadd.f32 %v1944_v18, %v1884_v51 }
 0x22a   :  { %v880_v26 = vpop.f32.mrf.mxu1 }
 0x22b   :  { %v2030_v5 = vadd.f32 %v880_v26, %v816_v16  ;;  %v969_v23 = vadd.f32 %v968_v33, %v904_v58  ;;  %v972_v7 = vadd.f32 %v971_v13, %v907_v56  ;;  %v915_v6 = vpop.f32.mrf.mxu2 }
 0x22d   :  { %1139 = vmatmul.f32.gmra.mxu1 %v409_v0  ;;  %v1042_v41 = vpop.f32.mrf.mxu0  ;;  %v1034_v22 = vadd.f32 %v1033_v63, %v969_v23  ;;  %v780_v0 = vadd.f32 %v1910_v44, %v715_v62  ;;  %v1037_v33 = vadd.f32 %v1036_v14, %v972_v7 }
 0x22f   :  { %v845_v19 = vadd.f32 %v1970_v24, %v780_v0  ;;  %v913_v24 = vadd.f32 %v912_v47, %v848_v20  ;;  %v986_v27 = vpop.f32.mrf.mxu3 }
 0x231   :  { %v910_v39 = vadd.f32 %v909_v30, %v845_v19  ;;  %v978_v30 = vadd.f32 %v977_v52, %v913_v24 }
 0x232   :  { %v1095_v55 = vpop.f32.mrf.mxu1 }
 0x233   :  { %v1096_v16 = vadd.f32 %v1095_v55, %v1031_v4  ;;  %v975_v9 = vadd.f32 %v974_v54, %v910_v39  ;;  %v918_v44 = vpop.f32.mrf.mxu2  ;;  %v786_v55 = vadd.f32 %v1926_v12, %v1862_v32  ;;  %v1043_v53 = vadd.f32 %v1042_v41, %v978_v30 }
 0x234   :  { %v919_v23 = vadd.f32 %v918_v44, %v854_v34 }
 0x235   :  { %v1143_v25 = vmax.f32 %v1096_v16, 0.0  ;;  %v1045_v37 = vpop.f32.mrf.mxu0  ;;  %v1040_v13 = vadd.f32 %v1039_v45, %v975_v9  ;;  %v851_v16 = vadd.f32 %v1984_v38, %v786_v55 }
 0x237   :  { %1195 = vmatmul.f32.vlgmr.msra.gmra.mxu2 %v1143_v25  ;;  %v916_v58 = vadd.f32 %v915_v6, %v851_v16  ;;  %v989_v1 = vpop.f32.mrf.mxu3 }
 0x239   :  { %v981_v47 = vadd.f32 %v980_v11, %v916_v58 }
 0x23a   :  { %v1098_v17 = vpop.f32.mrf.mxu1 }
 0x23b   :  { %v1099_v40 = vadd.f32 %v1098_v17, %v1034_v22  ;;  %v921_v54 = vpop.f32.mrf.mxu2  ;;  %v1046_v32 = vadd.f32 %v1045_v37, %v981_v47  ;;  %v984_v22 = vadd.f32 %v983_v8, %v919_v23 }
 0x23d   :  { %v1144_v26 = vmax.f32 %v1099_v40, 0.0  ;;  %v1048_v4 = vpop.f32.mrf.mxu0  ;;  %v857_v40 = vadd.f32 %v1997_v59, %v792_v43 }
 0x23e   :  { %v1049_v10 = vadd.f32 %v1048_v4, %v984_v22 }
 0x23f   :  { %1198 = vmatmul.f32.gmra.mxu2 %v1144_v26  ;;  %v922_v56 = vadd.f32 %v921_v54, %v857_v40  ;;  %v992_v7 = vpop.f32.mrf.mxu3 }
 0x241   :  { %v987_v26 = vadd.f32 %v986_v27, %v922_v56 }
 0x242   :  { %v1101_v15 = vpop.f32.mrf.mxu1 }
 0x243   :  { %v1102_v57 = vadd.f32 %v1101_v15, %v1037_v33  ;;  %v924_v38 = vpop.f32.mrf.mxu2 }
 0x244   :  { %v925_v51 = vadd.f32 %v924_v38, %v2000_v2 }
 0x245   :  { %v1145_v63 = vmax.f32 %v1102_v57, 0.0  ;;  %v1051_v25 = vpop.f32.mrf.mxu0 }
 0x246   :  { %v1052_v6 = vadd.f32 %v1051_v25, %v987_v26  ;;  %v990_v37 = vadd.f32 %v989_v1, %v925_v51 }
 0x247   :  { %1201 = vmatmul.f32.gmra.mxu2 %v1145_v63  ;;  %v995_v57 = vpop.f32.mrf.mxu3 }
 0x24a   :  { %v1104_v35 = vpop.f32.mrf.mxu1 }
 0x24b   :  { %v1105_v49 = vadd.f32 %v1104_v35, %v1040_v13  ;;  %v927_v0 = vpop.f32.mrf.mxu2 }
 0x24c   :  { %v928_v9 = vadd.f32 %v927_v0, %v2003_v31 }
 0x24d   :  { %v1146_v14 = vmax.f32 %v1105_v49, 0.0  ;;  %v1054_v17 = vpop.f32.mrf.mxu0 }
 0x24e   :  { %v1055_v59 = vadd.f32 %v1054_v17, %v990_v37  ;;  %v993_v44 = vadd.f32 %v992_v7, %v928_v9 }
 0x24f   :  { %1204 = vmatmul.f32.gmra.mxu2 %v1146_v14  ;;  %v998_v4 = vpop.f32.mrf.mxu3 }
 0x252   :  { %v1107_v3 = vpop.f32.mrf.mxu1 }
 0x253   :  { %v1108_v50 = vadd.f32 %v1107_v3, %v1043_v53  ;;  %v930_v15 = vpop.f32.mrf.mxu2 }
 0x254   :  { %v931_v2 = vadd.f32 %v930_v15, %v2006_v46 }
 0x255   :  { %v1147_v45 = vmax.f32 %v1108_v50, 0.0  ;;  %v1057_v11 = vpop.f32.mrf.mxu0 }
 0x256   :  { %v1058_v13 = vadd.f32 %v1057_v11, %v993_v44  ;;  %v996_v55 = vadd.f32 %v995_v57, %v931_v2  ;;  %v1374_v44 = vld [vmem:[#allocation3 + $0x8] sm:$0xff] }
 0x257   :  { %1207 = vmatmul.f32.gmra.mxu2 %v1147_v45  ;;  %v1001_v50 = vpop.f32.mrf.mxu3 }
 0x25a   :  { %v1110_v12 = vpop.f32.mrf.mxu1 }
 0x25b   :  { %v1111_v52 = vadd.f32 %v1110_v12, %v1046_v32  ;;  %v933_v35 = vpop.f32.mrf.mxu2 }
 0x25c   :  { %v934_v3 = vadd.f32 %v933_v35, %v2009_v28 }
 0x25d   :  { %v1148_v41 = vmax.f32 %v1111_v52, 0.0  ;;  %v1060_v21 = vpop.f32.mrf.mxu0 }
 0x25e   :  { %v1061_v30 = vadd.f32 %v1060_v21, %v996_v55  ;;  %v999_v27 = vadd.f32 %v998_v4, %v934_v3  ;;  %v1375_v4 = vld [vmem:[#allocation3 + $0x10] sm:$0xff] }
 0x25f   :  { %1210 = vmatmul.f32.gmra.mxu2 %v1148_v41  ;;  %v1004_v12 = vpop.f32.mrf.mxu3 }
 0x262   :  { %v1113_v36 = vpop.f32.mrf.mxu1 }
 0x263   :  { %v1114_v62 = vadd.f32 %v1113_v36, %v1049_v10  ;;  %v936_v31 = vpop.f32.mrf.mxu2 }
 0x264   :  { %v937_v46 = vadd.f32 %v936_v31, %v2012_v60 }
 0x265   :  { %v1149_v42 = vmax.f32 %v1114_v62, 0.0  ;;  %v1063_v14 = vpop.f32.mrf.mxu0 }
 0x266   :  { %v1064_v45 = vadd.f32 %v1063_v14, %v999_v27  ;;  %v1002_v34 = vadd.f32 %v1001_v50, %v937_v46 }
 0x267   :  { %1213 = vmatmul.f32.gmra.mxu2 %v1149_v42  ;;  %v1007_v40 = vpop.f32.mrf.mxu3 }
 0x26a   :  { %v1116_v19 = vpop.f32.mrf.mxu1 }
 0x26b   :  { %v1117_v33 = vadd.f32 %v1116_v19, %v1052_v6  ;;  %v939_v32 = vpop.f32.mrf.mxu2 }
 0x26c   :  { %v940_v41 = vadd.f32 %v939_v32, %v2017_v29  ;;  %v1379_v32 = vld [vmem:[#allocation3 + $0x30] sm:$0xff] }
 0x26d   :  { %v1150_v18 = vmax.f32 %v1117_v33, 0.0  ;;  %v1066_v58 = vpop.f32.mrf.mxu0 }
 0x26e   :  { %v1067_v52 = vadd.f32 %v1066_v58, %v1002_v34  ;;  %v1005_v43 = vadd.f32 %v1004_v12, %v940_v41 }
 0x26f   :  { %1216 = vmatmul.f32.gmra.mxu2 %v1150_v18  ;;  %v1010_v11 = vpop.f32.mrf.mxu3 }
 0x272   :  { %v1119_v39 = vpop.f32.mrf.mxu1 }
 0x273   :  { %v1120_v63 = vadd.f32 %v1119_v39, %v1055_v59  ;;  %v942_v22 = vpop.f32.mrf.mxu2 }
 0x274   :  { %v943_v62 = vadd.f32 %v942_v22, %v2022_v61  ;;  %v2070_v61 = vld [vmem:[%s2100_s6] ss:$0 sm:$0xff]  ;;  %s1524_s6 = smov [#allocation11]  }
 0x275   :  { %v1151_v20 = vmax.f32 %v1120_v63, 0.0  ;;  %v1069_v23 = vpop.f32.mrf.mxu0  ;;  %v1373_v63 = vld [vmem:[#allocation3] sm:$0xff]  ;;  %s1296_s23 = sshll.u32 %s1524_s6, 4  ;;  %s1297_s23 = int_to_ptr.vmem [resolvable:$true] %s1296_s23 }
 0x276   :  { %v1070_v17 = vadd.f32 %v1069_v23, %v1005_v43  ;;  %v1008_v42 = vadd.f32 %v1007_v40, %v943_v62  ;;  %v1382_v62 = vld [vmem:[#allocation3 + $0x48] sm:$0xff] }
 0x277   :  { %1219 = vmatmul.f32.gmra.mxu2 %v1151_v20 }
 0x27a   :  { %v1122_v8 = vpop.f32.mrf.mxu1 }
 0x27b   :  { %v1123_v49 = vadd.f32 %v1122_v8, %v1058_v13  ;;  %v945_v0 = vpop.f32.mrf.mxu2 }
 0x27c   :  { %v946_v29 = vadd.f32 %v945_v0, %v2030_v5 }
 0x27d   :  { %v1152_v24 = vmax.f32 %v1123_v49, 0.0  ;;  %v1072_v60 = vpop.f32.mrf.mxu0 }
 0x27e   :  { %v1073_v26 = vadd.f32 %v1072_v60, %v1008_v42  ;;  %v1011_v51 = vadd.f32 %v1010_v11, %v946_v29 }
 0x27f   :  { %1222 = vmatmul.f32.gmra.mxu2 %v1152_v24 }
 0x282   :  { %v1125_v16 = vpop.f32.mrf.mxu1 }
 0x283   :  { %v1126_v53 = vadd.f32 %v1125_v16, %v1061_v30  ;;  %v1376_v30 = vld [vmem:[#allocation3 + $0x18] sm:$0xff] }
 0x285   :  { %v1153_v54 = vmax.f32 %v1126_v53, 0.0  ;;  %v1075_v33 = vpop.f32.mrf.mxu0 }
 0x286   :  { %v1076_v18 = vadd.f32 %v1075_v33, %v1011_v51  ;;  %v1384_v33 = vld [vmem:[#allocation3 + $0x58] sm:$0xff] }
 0x287   :  { %1225 = vmatmul.f32.gmra.mxu2 %v1153_v54  ;;  %v1377_v54 = vld [vmem:[#allocation3 + $0x20] sm:$0xff] }
 0x28a   :  { %v1128_v25 = vpop.f32.mrf.mxu1 }
 0x28b   :  { %v1129_v48 = vadd.f32 %v1128_v25, %v1064_v45  ;;  %v1378_v25 = vld [vmem:[#allocation3 + $0x28] sm:$0xff] }
 0x28d   :  { %v1154_v47 = vmax.f32 %v1129_v48, 0.0 }
 0x28f   :  { %1228 = vmatmul.f32.gmra.mxu2 %v1154_v47 }
 0x292   :  { %v1131_v38 = vpop.f32.mrf.mxu1 }
 0x293   :  { %v1132_v28 = vadd.f32 %v1131_v38, %v1067_v52 }
 0x295   :  { %v1155_v1 = vmax.f32 %v1132_v28, 0.0  ;;  %v1380_v28 = vld [vmem:[#allocation3 + $0x38] sm:$0xff] }
 0x297   :  { %1231 = vmatmul.f32.gmra.mxu2 %v1155_v1 }
 0x29a   :  { %v1134_v10 = vpop.f32.mrf.mxu1 }
 0x29b   :  { %v1135_v36 = vadd.f32 %v1134_v10, %v1070_v17  ;;  %v1381_v17 = vld [vmem:[#allocation3 + $0x40] sm:$0xff] }
 0x29d   :  { %v1156_v56 = vmax.f32 %v1135_v36, 0.0 }
 0x29f   :  { %1234 = vmatmul.f32.gmra.mxu2 %v1156_v56 }
 0x2a2   :  { %v1137_v7 = vpop.f32.mrf.mxu1 }
 0x2a3   :  { %v1138_v6 = vadd.f32 %v1137_v7, %v1073_v26  ;;  %v1383_v7 = vld [vmem:[#allocation3 + $0x50] sm:$0xff] }
 0x2a5   :  { %v1157_v19 = vmax.f32 %v1138_v6, 0.0 }
 0x2a7   :  { %1237 = vmatmul.f32.gmra.mxu2 %v1157_v19 }
 0x2aa   :  { %v1140_v37 = vpop.f32.mrf.mxu1 }
 0x2ab   :  { %v1141_v15 = vadd.f32 %v1140_v37, %v1076_v18 }
 0x2ad   :  { %v1158_v59 = vmax.f32 %v1141_v15, 0.0 }
 0x2af   :  { %1240 = vmatmul.f32.gmra.mxu2 %v1158_v59  ;;  %v1385_v59 = vld [vmem:[#allocation3 + $0x60] sm:$0xff] }
 0x2ba   :  { %v1196_v57 = vpop.f32.mrf.mxu2 }
 0x2bb   :  { %v1197_v39 = vadd.f32 %v2070_v61, %v1196_v57 }
 0x2bd   :  { %v1244_v21 = vadd.f32 %v1373_v63, %v1197_v39 }
 0x2bf   :  { %v1260_v5 = vmax.f32 %v1244_v21, 0.0 }
 0x2c1   :  { %1276 = vst [vmem:[#allocation11] sm:$0xff] %v1260_v5  ;;  %v1386_v5 = vld [vmem:[#allocation3 + $0x68] sm:$0xff] }
 0x2c2   :  { %v1199_v9 = vpop.f32.mrf.mxu2 }
 0x2c3   :  { %v1200_v20 = vadd.f32 %v2070_v61, %v1199_v9 }
 0x2c5   :  { %v1245_v13 = vadd.f32 %v1374_v44, %v1200_v20 }
 0x2c7   :  { %v1261_v8 = vmax.f32 %v1245_v13, 0.0 }
 0x2c9   :  { %1277 = vst [vmem:[#allocation11 + $0x8] sm:$0xff] %v1261_v8  ;;  %v1387_v8 = vld [vmem:[#allocation3 + $0x70] sm:$0xff] }
 0x2ca   :  { %v1202_v35 = vpop.f32.mrf.mxu2 }
 0x2cb   :  { %v1203_v49 = vadd.f32 %v2070_v61, %v1202_v35 }
 0x2cd   :  { %v1246_v2 = vadd.f32 %v1375_v4, %v1203_v49 }
 0x2cf   :  { %v1262_v24 = vmax.f32 %v1246_v2, 0.0 }
 0x2d1   :  { %1278 = vst [vmem:[#allocation11 + $0x10] sm:$0xff] %v1262_v24  ;;  %v1388_v24 = vld [vmem:[#allocation3 + $0x78] sm:$0xff] }
 0x2d2   :  { %v1205_v14 = vpop.f32.mrf.mxu2 }
 0x2d3   :  { %v1206_v55 = vadd.f32 %v2070_v61, %v1205_v14 }
 0x2d5   :  { %v1247_v16 = vadd.f32 %v1376_v30, %v1206_v55 }
 0x2d7   :  { %v1263_v53 = vmax.f32 %v1247_v16, 0.0 }
 0x2d9   :  { %1279 = vst [vmem:[#allocation11 + $0x18] sm:$0xff] %v1263_v53 }
 0x2da   :  { %v1208_v3 = vpop.f32.mrf.mxu2 }
 0x2db   :  { %v1209_v31 = vadd.f32 %v2070_v61, %v1208_v3 }
 0x2dd   :  { %v1248_v50 = vadd.f32 %v1377_v54, %v1209_v31 }
 0x2df   :  { %v1264_v27 = vmax.f32 %v1248_v50, 0.0 }
 0x2e1   :  { %1280 = vst [vmem:[#allocation11 + $0x20] sm:$0xff] %v1264_v27 }
 0x2e2   :  { %v1211_v58 = vpop.f32.mrf.mxu2 }
 0x2e3   :  { %v1212_v45 = vadd.f32 %v2070_v61, %v1211_v58 }
 0x2e5   :  { %v1249_v48 = vadd.f32 %v1378_v25, %v1212_v45 }
 0x2e7   :  { %v1265_v46 = vmax.f32 %v1249_v48, 0.0 }
 0x2e9   :  { %1281 = vst [vmem:[#allocation11 + $0x28] sm:$0xff] %v1265_v46 }
 0x2ea   :  { %v1214_v47 = vpop.f32.mrf.mxu2 }
 0x2eb   :  { %v1215_v34 = vadd.f32 %v2070_v61, %v1214_v47 }
 0x2ed   :  { %v1250_v12 = vadd.f32 %v1379_v32, %v1215_v34 }
 0x2ef   :  { %v1266_v52 = vmax.f32 %v1250_v12, 0.0 }
 0x2f1   :  { %1282 = vst [vmem:[#allocation11 + $0x30] sm:$0xff] %v1266_v52 }
 0x2f2   :  { %v1217_v23 = vpop.f32.mrf.mxu2 }
 0x2f3   :  { %v1218_v38 = vadd.f32 %v2070_v61, %v1217_v23 }
 0x2f5   :  { %v1251_v41 = vadd.f32 %v1380_v28, %v1218_v38 }
 0x2f7   :  { %v1267_v1 = vmax.f32 %v1251_v41, 0.0 }
 0x2f9   :  { %1283 = vst [vmem:[#allocation11 + $0x38] sm:$0xff] %v1267_v1 }
 0x2fa   :  { %v1220_v43 = vpop.f32.mrf.mxu2 }
 0x2fb   :  { %v1221_v22 = vadd.f32 %v2070_v61, %v1220_v43 }
 0x2fd   :  { %v1252_v40 = vadd.f32 %v1381_v17, %v1221_v22 }
 0x2ff   :  { %v1268_v10 = vmax.f32 %v1252_v40, 0.0 }
 0x301   :  { %1284 = vst [vmem:[#allocation11 + $0x40] sm:$0xff] %v1268_v10 }
 0x302   :  { %v1223_v36 = vpop.f32.mrf.mxu2 }
 0x303   :  { %v1224_v60 = vadd.f32 %v2070_v61, %v1223_v36 }
 0x305   :  { %v1253_v56 = vadd.f32 %v1382_v62, %v1224_v60 }
 0x307   :  { %v1269_v42 = vmax.f32 %v1253_v56, 0.0 }
 0x309   :  { %1285 = vst [vmem:[#allocation11 + $0x48] sm:$0xff] %v1269_v42 }
 0x30a   :  { %v1226_v26 = vpop.f32.mrf.mxu2 }
 0x30b   :  { %v1227_v0 = vadd.f32 %v2070_v61, %v1226_v26 }
 0x30d   :  { %v1254_v6 = vadd.f32 %v1383_v7, %v1227_v0 }
 0x30f   :  { %v1270_v11 = vmax.f32 %v1254_v6, 0.0 }
 0x311   :  { %1286 = vst [vmem:[#allocation11 + $0x50] sm:$0xff] %v1270_v11 }
 0x312   :  { %v1229_v29 = vpop.f32.mrf.mxu2 }
 0x313   :  { %v1230_v19 = vadd.f32 %v2070_v61, %v1229_v29 }
 0x315   :  { %v1255_v51 = vadd.f32 %v1384_v33, %v1230_v19 }
 0x317   :  { %v1271_v18 = vmax.f32 %v1255_v51, 0.0 }
 0x319   :  { %1287 = vst [vmem:[#allocation11 + $0x58] sm:$0xff] %v1271_v18 }
 0x31a   :  { %v1232_v37 = vpop.f32.mrf.mxu2 }
 0x31b   :  { %v1233_v15 = vadd.f32 %v2070_v61, %v1232_v37 }
 0x31d   :  { %v1256_v57 = vadd.f32 %v1385_v59, %v1233_v15 }
 0x31f   :  { %v1272_v39 = vmax.f32 %v1256_v57, 0.0 }
 0x321   :  { %1288 = vst [vmem:[#allocation11 + $0x60] sm:$0xff] %v1272_v39 }
 0x322   :  { %v1235_v63 = vpop.f32.mrf.mxu2 }
 0x323   :  { %v1236_v21 = vadd.f32 %v2070_v61, %v1235_v63 }
 0x325   :  { %v1257_v9 = vadd.f32 %v1386_v5, %v1236_v21 }
 0x327   :  { %v1273_v20 = vmax.f32 %v1257_v9, 0.0 }
 0x329   :  { %1289 = vst [vmem:[#allocation11 + $0x68] sm:$0xff] %v1273_v20 }
 0x32a   :  { %v1238_v44 = vpop.f32.mrf.mxu2 }
 0x32b   :  { %v1239_v13 = vadd.f32 %v2070_v61, %v1238_v44 }
 0x32d   :  { %v1258_v35 = vadd.f32 %v1387_v8, %v1239_v13 }
 0x32f   :  { %v1274_v49 = vmax.f32 %v1258_v35, 0.0 }
 0x331   :  { %1290 = vst [vmem:[#allocation11 + $0x70] sm:$0xff] %v1274_v49 }
 0x332   :  { %v1241_v4 = vpop.f32.mrf.mxu2 }
 0x333   :  { %v1242_v2 = vadd.f32 %v2070_v61, %v1241_v4 }
 0x335   :  { %v1259_v14 = vadd.f32 %v1388_v24, %v1242_v2 }
 0x337   :  { %v1275_v55 = vmax.f32 %v1259_v14, 0.0 }
 0x339   :  { %1291 = vst [vmem:[#allocation11 + $0x78] sm:$0xff] %v1275_v55 }
 0x33a   :  { %1304 = dma.vmem_to_hbm [thread:$0]  %s1297_s23, 2048, %s1299_s26, [#allocation5], %s1518_s9, %s1518_s9, %s1519_s10  }
 0x33b   :  { %1515 = dma.done.wait [#allocation5], 2048  }
 0x33c   :  { %1516 = vsyncadd [#allocation5], 4294965248 }
 0x33d   :  { %1309 = vsyncpa [#allocation4], 1 }
 0x33e   :  { %1310 = vsyncpa [#allocation7], 1 }
 0x33f   :  { %1311 = vsyncpa [#allocation10], 1 }
 0x340   :  { %1312 = vsyncpa [#allocation5], 1 }

</bundles_post_ra>
